<compile_context>
chip_gen: v7x
topology: tpu7x:2x2x1
jax: 0.10.0
libtpu: 0.0.40
codegen_flags: <defaults>
</compile_context>

<pallas_src>
import functools

import jax
import jax.numpy as jnp
from jax.experimental import pallas as pl
from jax.experimental.pallas import tpu as pltpu

IN_FEATURES = 28 * 28          # 784
K_PAD = 896                    # 784 padded to 7*128 -> aligned MXU contraction dim
HIDDEN = 512
OUT_FEATURES = 10
OUT_PAD = 128                  # 10 padded to one full lane group -> unmasked stores
DEFAULT_TILE_N = 512           # target batch tile (balanced / split further below)


def _round_up(x, m):
    return ((x + m - 1) // m) * m


def _cdiv(a, b):
    return -(-a // b)


def _resident_spec(shape):
    """BlockSpec for an operand that stays VMEM-resident across all batch tiles.

    Constant block index -> fetched once.  pipeline_mode=pl.Buffered(1) single-
    buffers it (a second pipeline buffer is never needed), freeing ~1.5 MiB VMEM.
    Falls back gracefully if the installed JAX predates `pipeline_mode`.
    """
    index_map = lambda i: (0,) * len(shape)
    try:
        return pl.BlockSpec(shape, index_map, pipeline_mode=pl.Buffered(1))
    except (TypeError, AttributeError):
        return pl.BlockSpec(shape, index_map)


def mlp_kernel(x_ref, w1_ref, b1_ref, w2_ref, b2_ref, w3_ref, b3_ref, o_ref):
    """One batch tile of the fused MLP: (Linear+ReLU) x2 + Linear.

    x tile arrives as bf16 (staged by the wrapper), weights are bf16 and
    VMEM-resident across all tiles, accumulation is f32 on the MXU, bias/ReLU
    on the VPU, logits stored bf16 into a lane-dense 128-wide padded output.
    """
    h1 = jnp.dot(x_ref[...], w1_ref[...], preferred_element_type=jnp.float32)   # (tn, 512)
    h1 = jnp.maximum(h1 + b1_ref[...], 0.0).astype(jnp.bfloat16)

    h2 = jnp.dot(h1, w2_ref[...], preferred_element_type=jnp.float32)           # (tn, 512)
    h2 = jnp.maximum(h2 + b2_ref[...], 0.0).astype(jnp.bfloat16)

    logits = jnp.dot(h2, w3_ref[...], preferred_element_type=jnp.float32)       # (tn, 128)
    o_ref[...] = (logits + b3_ref[...]).astype(o_ref.dtype)


def prepare_params(w1, b1, w2, b2, w3, b3):
    """One-time weight prep (do NOT run per forward call).

    PyTorch (out, in) f32 weights -> (in, out) bf16, zero-padded:
      w1: (512, 784) -> (896, 512) bf16   (extra K rows are zero)
      w2: (512, 512) -> (512, 512) bf16
      w3: (10, 512)  -> (512, 128) bf16   (extra out cols are zero)
    Biases stay f32 as (1, out) rows; b3 is padded to (1, 128).
    """
    w1p = jnp.zeros((K_PAD, HIDDEN), jnp.float32).at[:IN_FEATURES, :].set(w1.T)
    w3p = jnp.zeros((HIDDEN, OUT_PAD), jnp.float32).at[:, :OUT_FEATURES].set(w3.T)
    b3p = jnp.zeros((1, OUT_PAD), jnp.float32).at[0, :OUT_FEATURES].set(b3)
    return (
        w1p.astype(jnp.bfloat16), b1[None, :].astype(jnp.float32),
        w2.T.astype(jnp.bfloat16), b2[None, :].astype(jnp.float32),
        w3p.astype(jnp.bfloat16), b3p,
    )


def _choose_tiling(n, tile_n):
    """Balanced batch tiling.

    - Rows padded to the 8-row sublane granule.
    - Work split into ~equal tiles so a batch just over tile_n doesn't pay for a
      near-empty trailing tile (e.g. N=300 -> 2x152, not 256+44-of-256).
    - When there is enough work, use an even number (>= 2) of tiles so the
      "parallel" grid axis shards evenly across both v7x TensorCores.
    """
    n_rows = _round_up(max(n, 1), 8)
    num_tiles = max(_cdiv(n_rows, tile_n), 1)
    if num_tiles == 1 and n_rows >= 16:
        num_tiles = 2                      # give the second TC work on v7x
    elif num_tiles > 1 and num_tiles % 2:
        num_tiles += 1                     # even tile count -> balanced megacore split
    eff_tile = _round_up(_cdiv(n_rows, num_tiles), 8)
    num_tiles = _cdiv(n_rows, eff_tile)
    n_pad = eff_tile * num_tiles
    return eff_tile, num_tiles, n_pad


@functools.partial(jax.jit, static_argnames=("tile_n",))
def neural_network_forward(x, params, tile_n=DEFAULT_TILE_N):
    """Equivalent of NeuralNetwork.forward.

    x:      (N, 28, 28) float32 (any leading batch size)
    params: output of prepare_params (bf16 (in,out) weights, f32 (1,out) biases)
    returns logits (N, 10) float32
    """
    w1p, b1r, w2p, b2r, w3p, b3r = params
    n = x.shape[0]
    eff_tile, num_tiles, n_pad = _choose_tiling(n, tile_n)

    # nn.Flatten + bf16 cast + (batch, K) zero-pad in ONE fused XLA pass over x:
    # reads f32, writes bf16 -> staging pass moves half the bytes, and the
    # kernel's per-tile x DMA is halved too.
    x_flat = x.reshape(n, IN_FEATURES).astype(jnp.bfloat16)
    x_pad = jnp.pad(x_flat, ((0, n_pad - n), (0, K_PAD - IN_FEATURES)))

    out = pl.pallas_call(
        mlp_kernel,
        out_shape=jax.ShapeDtypeStruct((n_pad, OUT_PAD), jnp.bfloat16),
        grid=(num_tiles,),
        in_specs=[
            pl.BlockSpec((eff_tile, K_PAD), lambda i: (i, 0)),
            _resident_spec(w1p.shape), _resident_spec(b1r.shape),
            _resident_spec(w2p.shape), _resident_spec(b2r.shape),
            _resident_spec(w3p.shape), _resident_spec(b3r.shape),
        ],
        out_specs=pl.BlockSpec((eff_tile, OUT_PAD), lambda i: (i, 0)),
        compiler_params=pltpu.CompilerParams(
            dimension_semantics=("parallel",),      # shard batch tiles across TCs (v7x)
            vmem_limit_bytes=32 << 20,              # headroom for tile_n up to 1024
        ),
    )(x_pad, w1p, b1r, w2p, b2r, w3p, b3r)

    # Padded batch rows hold bias-only logits and padded columns hold only the
    # zero-padded bias; both are sliced off here.  Upcast bf16 writeback to f32.
    return out[:n, :OUT_FEATURES].astype(jnp.float32)


def init_params(key):
    """Deterministic PyTorch-style (Kaiming-uniform-ish) init for the 3 Linears."""
    def linear_init(k, out_f, in_f):
        k_w, k_b = jax.random.split(k)
        bound = 1.0 / jnp.sqrt(in_f)
        w = jax.random.uniform(k_w, (out_f, in_f), jnp.float32, -bound, bound)
        b = jax.random.uniform(k_b, (out_f,), jnp.float32, -bound, bound)
        return w, b

    k1, k2, k3 = jax.random.split(key, 3)
    w1, b1 = linear_init(k1, HIDDEN, IN_FEATURES)
    w2, b2 = linear_init(k2, HIDDEN, HIDDEN)
    w3, b3 = linear_init(k3, OUT_FEATURES, HIDDEN)
    return w1, b1, w2, b2, w3, b3


if __name__ == "__main__":
    key = jax.random.PRNGKey(0)
    k_x, k_p = jax.random.split(key)

    # Small batch of images, consistent with the module (torch.rand(3, 28, 28)).
    x = jax.random.uniform(k_x, (3, 28, 28), jnp.float32)
    raw = init_params(k_p)
    params = prepare_params(*raw)            # one-time prep, outside the call path

    logits = neural_network_forward(x, params)
    jax.block_until_ready(logits)

    # References.
    w1, b1, w2, b2, w3, b3 = raw
    xf = x.reshape(x.shape[0], -1)

    # (a) bf16-weight reference (same arithmetic as the kernel, f32 accumulation);
    #     the kernel additionally rounds the final logits to bf16, hence 1e-2 tol.
    h = jnp.dot(xf.astype(jnp.bfloat16), w1.T.astype(jnp.bfloat16),
                preferred_element_type=jnp.float32) + b1
    h = jnp.maximum(h, 0.0)
    h = jnp.dot(h.astype(jnp.bfloat16), w2.T.astype(jnp.bfloat16),
                preferred_element_type=jnp.float32) + b2
    h = jnp.maximum(h, 0.0)
    ref_bf16 = jnp.dot(h.astype(jnp.bfloat16), w3.T.astype(jnp.bfloat16),
                       preferred_element_type=jnp.float32) + b3

    # (b) full-f32 PyTorch-semantics reference (loose tolerance due to bf16 weights).
    hf = jnp.maximum(xf @ w1.T + b1, 0.0)
    hf = jnp.maximum(hf @ w2.T + b2, 0.0)
    ref_f32 = hf @ w3.T + b3

    assert logits.shape == (3, 10)
    assert jnp.allclose(logits, ref_bf16, atol=1e-2, rtol=1e-2)
    assert jnp.allclose(logits, ref_f32, atol=5e-2, rtol=5e-2)

    print("KERNEL_OK")
</pallas_src>

<mosaic_0001>
module attributes {stable_mosaic.version = 11 : i64} {
  func.func @mlp_kernel(%arg0: i32, %arg1: memref<8x896xbf16, #tpu.memory_space<vmem>>, %arg2: memref<896x512xbf16, #tpu.memory_space<vmem>>, %arg3: memref<1x512xf32, #tpu.memory_space<vmem>>, %arg4: memref<512x512xbf16, #tpu.memory_space<vmem>>, %arg5: memref<1x512xf32, #tpu.memory_space<vmem>>, %arg6: memref<512x128xbf16, #tpu.memory_space<vmem>>, %arg7: memref<1x128xf32, #tpu.memory_space<vmem>>, %arg8: memref<8x128xbf16, #tpu.memory_space<vmem>>) attributes {dimension_semantics = [#tpu.dimension_semantics<parallel>], iteration_bounds = array<i64: 1>, scalar_prefetch = 0 : i64, scratch_operands = 0 : i64, tpu.core_type = #tpu.core_type<tc>, window_params = [{transform_indices = @transform_0, window_bounds = array<i64: 8, 896>}, {pipeline_mode = #tpu.pipeline_mode<synchronous>, transform_indices = @transform_1, window_bounds = array<i64: 896, 512>}, {pipeline_mode = #tpu.pipeline_mode<synchronous>, transform_indices = @transform_2, window_bounds = array<i64: 1, 512>}, {pipeline_mode = #tpu.pipeline_mode<synchronous>, transform_indices = @transform_3, window_bounds = array<i64: 512, 512>}, {pipeline_mode = #tpu.pipeline_mode<synchronous>, transform_indices = @transform_4, window_bounds = array<i64: 1, 512>}, {pipeline_mode = #tpu.pipeline_mode<synchronous>, transform_indices = @transform_5, window_bounds = array<i64: 512, 128>}, {pipeline_mode = #tpu.pipeline_mode<synchronous>, transform_indices = @transform_6, window_bounds = array<i64: 1, 128>}, {transform_indices = @transform_7, window_bounds = array<i64: 8, 128>}]} {
    %c0 = arith.constant 0 : index
    %c0_0 = arith.constant 0 : index
    %0 = vector.load %arg1[%c0, %c0_0] : memref<8x896xbf16, #tpu.memory_space<vmem>>, vector<8x896xbf16>
    %c0_1 = arith.constant 0 : index
    %c0_2 = arith.constant 0 : index
    %1 = vector.load %arg2[%c0_1, %c0_2] : memref<896x512xbf16, #tpu.memory_space<vmem>>, vector<896x512xbf16>
    %cst = arith.constant dense<0.000000e+00> : vector<8x512xf32>
    %2 = tpu.matmul %0, %1, %cst {dimension_numbers = #tpu.dot_dimension_numbers<[1], [0], [0], [1], [0, 0, 1, 1], [], []>} : vector<8x896xbf16>, vector<896x512xbf16>, vector<8x512xf32> -> vector<8x512xf32>
    %c0_3 = arith.constant 0 : index
    %c0_4 = arith.constant 0 : index
    %3 = vector.load %arg3[%c0_3, %c0_4] : memref<1x512xf32, #tpu.memory_space<vmem>>, vector<1x512xf32>
    %4 = vector.broadcast %3 : vector<1x512xf32> to vector<8x512xf32>
    %5 = arith.addf %2, %4 : vector<8x512xf32>
    %cst_5 = arith.constant 0.000000e+00 : f32
    %6 = vector.broadcast %cst_5 : f32 to vector<8x512xf32>
    %7 = arith.maximumf %5, %6 : vector<8x512xf32>
    %8 = arith.truncf %7 : vector<8x512xf32> to vector<8x512xbf16>
    %c0_6 = arith.constant 0 : index
    %c0_7 = arith.constant 0 : index
    %9 = vector.load %arg4[%c0_6, %c0_7] : memref<512x512xbf16, #tpu.memory_space<vmem>>, vector<512x512xbf16>
    %cst_8 = arith.constant dense<0.000000e+00> : vector<8x512xf32>
    %10 = tpu.matmul %8, %9, %cst_8 {dimension_numbers = #tpu.dot_dimension_numbers<[1], [0], [0], [1], [0, 0, 1, 1], [], []>} : vector<8x512xbf16>, vector<512x512xbf16>, vector<8x512xf32> -> vector<8x512xf32>
    %c0_9 = arith.constant 0 : index
    %c0_10 = arith.constant 0 : index
    %11 = vector.load %arg5[%c0_9, %c0_10] : memref<1x512xf32, #tpu.memory_space<vmem>>, vector<1x512xf32>
    %12 = vector.broadcast %11 : vector<1x512xf32> to vector<8x512xf32>
    %13 = arith.addf %10, %12 : vector<8x512xf32>
    %cst_11 = arith.constant 0.000000e+00 : f32
    %14 = vector.broadcast %cst_11 : f32 to vector<8x512xf32>
    %15 = arith.maximumf %13, %14 : vector<8x512xf32>
    %16 = arith.truncf %15 : vector<8x512xf32> to vector<8x512xbf16>
    %c0_12 = arith.constant 0 : index
    %c0_13 = arith.constant 0 : index
    %17 = vector.load %arg6[%c0_12, %c0_13] : memref<512x128xbf16, #tpu.memory_space<vmem>>, vector<512x128xbf16>
    %cst_14 = arith.constant dense<0.000000e+00> : vector<8x128xf32>
    %18 = tpu.matmul %16, %17, %cst_14 {dimension_numbers = #tpu.dot_dimension_numbers<[1], [0], [0], [1], [0, 0, 1, 1], [], []>} : vector<8x512xbf16>, vector<512x128xbf16>, vector<8x128xf32> -> vector<8x128xf32>
    %c0_15 = arith.constant 0 : index
    %c0_16 = arith.constant 0 : index
    %19 = vector.load %arg7[%c0_15, %c0_16] : memref<1x128xf32, #tpu.memory_space<vmem>>, vector<1x128xf32>
    %20 = vector.broadcast %19 : vector<1x128xf32> to vector<8x128xf32>
    %21 = arith.addf %18, %20 : vector<8x128xf32>
    %22 = arith.truncf %21 : vector<8x128xf32> to vector<8x128xbf16>
    %c0_17 = arith.constant 0 : index
    %c0_18 = arith.constant 0 : index
    %23 = vector.load %arg8[%c0_17, %c0_18] : memref<8x128xbf16, #tpu.memory_space<vmem>>, vector<8x128xbf16>
    tpu.vector_store %arg8[%c0_17, %c0_18], %22 {strides = array<i32>} : memref<8x128xbf16, #tpu.memory_space<vmem>>, vector<8x128xbf16>,
    return
  }
  func.func @transform_0(%arg0: i32) -> (i32, i32) {
    %c0_i32 = arith.constant 0 : i32
    %c0_i32_0 = arith.constant 0 : i32
    return %arg0, %c0_i32 : i32, i32
  }
  func.func @transform_1(%arg0: i32) -> (i32, i32) {
    %c0_i32 = arith.constant 0 : i32
    %c0_i32_0 = arith.constant 0 : i32
    %c0_i32_1 = arith.constant 0 : i32
    return %c0_i32, %c0_i32_0 : i32, i32
  }
  func.func @transform_2(%arg0: i32) -> (i32, i32) {
    %c0_i32 = arith.constant 0 : i32
    %c0_i32_0 = arith.constant 0 : i32
    %c0_i32_1 = arith.constant 0 : i32
    return %c0_i32, %c0_i32_0 : i32, i32
  }
  func.func @transform_3(%arg0: i32) -> (i32, i32) {
    %c0_i32 = arith.constant 0 : i32
    %c0_i32_0 = arith.constant 0 : i32
    %c0_i32_1 = arith.constant 0 : i32
    return %c0_i32, %c0_i32_0 : i32, i32
  }
  func.func @transform_4(%arg0: i32) -> (i32, i32) {
    %c0_i32 = arith.constant 0 : i32
    %c0_i32_0 = arith.constant 0 : i32
    %c0_i32_1 = arith.constant 0 : i32
    return %c0_i32, %c0_i32_0 : i32, i32
  }
  func.func @transform_5(%arg0: i32) -> (i32, i32) {
    %c0_i32 = arith.constant 0 : i32
    %c0_i32_0 = arith.constant 0 : i32
    %c0_i32_1 = arith.constant 0 : i32
    return %c0_i32, %c0_i32_0 : i32, i32
  }
  func.func @transform_6(%arg0: i32) -> (i32, i32) {
    %c0_i32 = arith.constant 0 : i32
    %c0_i32_0 = arith.constant 0 : i32
    %c0_i32_1 = arith.constant 0 : i32
    return %c0_i32, %c0_i32_0 : i32, i32
  }
  func.func @transform_7(%arg0: i32) -> (i32, i32) {
    %c0_i32 = arith.constant 0 : i32
    %c0_i32_0 = arith.constant 0 : i32
    return %arg0, %c0_i32 : i32, i32
  }
}

</mosaic_0001>

<bundles_post_ra>
// kernel: neural_network_forward.1
= control target key start
LH: loop header
LB: loop body
LE: loop exit
PB: predicated region body
PF: predicated region fallthrough
CT: control target
= control target key end

     0   :  { %12 = vsyncpa [#allocation3], 0  ;;  %s4427_s0 = inlined_call_operand.vmem [shape: bf16[8,896], index: 0, kind: input, shape index: {}]   ;;  %s4428_s1 = inlined_call_operand.hbm [shape: bf16[896,512], index: 1, kind: input, shape index: {}]   ;;  %s4429_s2 = inlined_call_operand.vmem [shape: f32[1,512], index: 2, kind: input, shape index: {}]   ;;  %s4430_s3 = inlined_call_operand.hbm [shape: bf16[512,512], index: 3, kind: input, shape index: {}]   ;;  %s4431_s4 = inlined_call_operand.vmem [shape: f32[1,512], index: 4, kind: input, shape index: {}]   ;;  %s4432_s5 = inlined_call_operand.vmem [shape: bf16[512,128], index: 5, kind: input, shape index: {}]   ;;  %s4433_s6 = inlined_call_operand.vmem [shape: f32[1,128], index: 6, kind: input, shape index: {}]   ;;  %s4434_s7 = inlined_call_operand.vmem [shape: bf16[8,128], index: 7, kind: output, shape index: {}]  }
   0x1   :  { %13 = vsyncpa [#allocation5], 0  ;;  %s4195_s24 = smov [#allocation2]   ;;  %s4147_s28 = scalar_lea.hbm %s4428_s1, 28672 }
   0x2   :  { %s21_s25 = sshll.u32 %s4195_s24, 4  ;;  %p4148_p0 = scmp.ne.s32.totalorder %s4428_s1, %s4147_s28  ;;  %s22_s25 = int_to_ptr.vmem [resolvable:$true] %s21_s25 }
   0x3   :  { %p4151_p1 = scmp.lt.u32.totalorder %s4147_s28, %s4428_s1 }
   0x5   :  { %p4153_p2 = pnand %p4151_p1, %p4148_p0 }
   0x7   :  { %4156 = shalt.err (!%p4153_p2)
}
   0x8   :  { %s4157_s10 = scalar_lea.vmem %s22_s25, 28672  ;;  %p4162_p4 = scmp.lt.s32.totalorder %s22_s25, %s22_s25 }
   0x9   :  { %p4158_p3 = scmp.ne.s32.totalorder %s22_s25, %s4157_s10  ;;  %p4163_p5 = scmp.lt.s32.totalorder %s4157_s10, %s4157_s10 }
   0xb   :  { %p4164_p6 = por %p4163_p5, %p4162_p4 }
   0xd   :  { %p4165_p7 = pnand %p4164_p6, %p4158_p3 }
   0xf   :  { %4168 = shalt.err (!%p4165_p7)
}
  0x10   :  { %s4196_s11 = smov 256   ;;  %s4197_s12 = smov 16  }
  0x11   :  { %27 = dma.hbm_to_vmem [thread:$0]  %s4428_s1, 28672, %s22_s25, [#allocation3], %s4196_s11, %s4196_s11, %s4197_s12  }
  0x12   :  { %s4198_s15 = smov [#allocation4]   ;;  %s4169_s19 = scalar_lea.hbm %s4430_s3, 16384 }
  0x13   :  { %s35_s16 = sshll.u32 %s4198_s15, 4  ;;  %p4170_p8 = scmp.ne.s32.totalorder %s4430_s3, %s4169_s19  ;;  %s36_s16 = int_to_ptr.vmem [resolvable:$true] %s35_s16 }
  0x14   :  { %p4173_p9 = scmp.lt.u32.totalorder %s4169_s19, %s4430_s3 }
  0x16   :  { %p4175_p10 = pnand %p4173_p9, %p4170_p8 }
  0x18   :  { %4178 = shalt.err (!%p4175_p10)
}
  0x19   :  { %s4179_s24 = scalar_lea.vmem %s36_s16, 16384  ;;  %p4184_p12 = scmp.lt.s32.totalorder %s36_s16, %s36_s16 }
  0x1a   :  { %p4180_p11 = scmp.ne.s32.totalorder %s36_s16, %s4179_s24  ;;  %p4185_p13 = scmp.lt.s32.totalorder %s4179_s24, %s4179_s24 }
  0x1c   :  { %p4186_p0 = por %p4185_p13, %p4184_p12 }
  0x1e   :  { %p4187_p1 = pnand %p4186_p0, %p4180_p11 }
  0x20   :  { %4190 = shalt.err (!%p4187_p1)
}
  0x21   :  { %41 = dma.hbm_to_vmem [thread:$0]  %s4430_s3, 16384, %s36_s16, [#allocation5], %s4196_s11, %s4196_s11, %s4197_s12  }
  0x22   :  { %4191 = dma.done.wait [#allocation3], 28672  }
  0x23   :  { %4192 = vsyncadd [#allocation3], 4294938624 }
  0x24   :  { %4193 = dma.done.wait [#allocation5], 16384  }
  0x25   :  { %4194 = vsyncadd [#allocation5], 4294950912  ;;  %v3580_v0 = vld [vmem:[#allocation2 + $0x4] ss:$16 sps:$4 sm:$0xff]   ;;  %v3582_v1 = vld [vmem:[#allocation2 + $0xc] ss:$16 sps:$4 sm:$0xff]  }
  0x26   :  { %1450 = vmatprep.subr.bf16.mxu0 %v3580_v0  ;;  %v3584_v2 = vld [vmem:[#allocation2] ss:$16 sps:$4 sm:$0xff]   ;;  %v3585_v3 = vld [vmem:[#allocation2 + $0x8] ss:$16 sps:$4 sm:$0xff]   ;;  %1614 = vmatprep.subr.bf16.mxu1 %v3582_v1  ;;  %v3586_v4 = vld [vmem:[#allocation2 + $0x24] ss:$16 sps:$4 sm:$0xff]  }
  0x27   :  { %1451 = vmatpush1.bf16.msra.mxu0 %v3584_v2  ;;  %1615 = vmatpush1.bf16.msra.mxu1 %v3585_v3  ;;  %v3588_v5 = vld [vmem:[#allocation2 + $0x2c] ss:$16 sps:$4 sm:$0xff]   ;;  %v3590_v6 = vld [vmem:[#allocation2 + $0x20] ss:$16 sps:$4 sm:$0xff]   ;;  %v3591_v7 = vld [vmem:[#allocation2 + $0x28] ss:$16 sps:$4 sm:$0xff]  }
  0x28   :  { %1452 = vmatprep.subr.bf16.mxu0 %v3586_v4  ;;  %1616 = vmatprep.subr.bf16.mxu1 %v3588_v5  ;;  %v3592_v8 = vld [vmem:[#allocation2 + $0x44] ss:$16 sps:$4 sm:$0xff]   ;;  %v3594_v9 = vld [vmem:[#allocation2 + $0x4c] ss:$16 sps:$4 sm:$0xff]   ;;  %v3596_v10 = vld [vmem:[#allocation2 + $0x40] ss:$16 sps:$4 sm:$0xff]  }
  0x29   :  { %v3597_v11 = vld [vmem:[#allocation2 + $0x48] ss:$16 sps:$4 sm:$0xff]   ;;  %v3598_v12 = vld [vmem:[#allocation2 + $0x64] ss:$16 sps:$4 sm:$0xff]   ;;  %v3600_v13 = vld [vmem:[#allocation2 + $0x6c] ss:$16 sps:$4 sm:$0xff]  }
  0x2a   :  { %v3602_v14 = vld [vmem:[#allocation2 + $0x60] ss:$16 sps:$4 sm:$0xff]   ;;  %v3603_v15 = vld [vmem:[#allocation2 + $0x68] ss:$16 sps:$4 sm:$0xff]   ;;  %v3604_v16 = vld [vmem:[#allocation2 + $0x84] ss:$16 sps:$4 sm:$0xff]  }
  0x2b   :  { %1453 = vmatpush1.bf16.msra.mxu0 %v3590_v6  ;;  %1617 = vmatpush1.bf16.msra.mxu1 %v3591_v7  ;;  %v3606_v17 = vld [vmem:[#allocation2 + $0x8c] ss:$16 sps:$4 sm:$0xff]   ;;  %v3608_v18 = vld [vmem:[#allocation2 + $0x80] ss:$16 sps:$4 sm:$0xff]   ;;  %v3609_v19 = vld [vmem:[#allocation2 + $0x88] ss:$16 sps:$4 sm:$0xff]  }
  0x2c   :  { %1454 = vmatprep.subr.bf16.mxu0 %v3592_v8  ;;  %1618 = vmatprep.subr.bf16.mxu1 %v3594_v9  ;;  %v3610_v20 = vld [vmem:[#allocation2 + $0xa4] ss:$16 sps:$4 sm:$0xff]   ;;  %v3612_v21 = vld [vmem:[#allocation2 + $0xac] ss:$16 sps:$4 sm:$0xff]   ;;  %v3614_v22 = vld [vmem:[#allocation2 + $0xa0] ss:$16 sps:$4 sm:$0xff]  }
  0x2d   :  { %v3615_v23 = vld [vmem:[#allocation2 + $0xa8] ss:$16 sps:$4 sm:$0xff]   ;;  %v3616_v24 = vld [vmem:[#allocation2 + $0xc4] ss:$16 sps:$4 sm:$0xff]   ;;  %v3618_v25 = vld [vmem:[#allocation2 + $0xcc] ss:$16 sps:$4 sm:$0xff]  }
  0x2e   :  { %v3620_v26 = vld [vmem:[#allocation2 + $0xc0] ss:$16 sps:$4 sm:$0xff]   ;;  %v3621_v27 = vld [vmem:[#allocation2 + $0xc8] ss:$16 sps:$4 sm:$0xff]   ;;  %v3622_v28 = vld [vmem:[#allocation2 + $0xe4] ss:$16 sps:$4 sm:$0xff]  }
  0x2f   :  { %1455 = vmatpush1.bf16.msra.mxu0 %v3596_v10  ;;  %1619 = vmatpush1.bf16.msra.mxu1 %v3597_v11  ;;  %v3624_v29 = vld [vmem:[#allocation2 + $0xec] ss:$16 sps:$4 sm:$0xff]   ;;  %v3626_v30 = vld [vmem:[#allocation2 + $0xe0] ss:$16 sps:$4 sm:$0xff]   ;;  %v3627_v31 = vld [vmem:[#allocation2 + $0xe8] ss:$16 sps:$4 sm:$0xff]  }
  0x30   :  { %1456 = vmatprep.subr.bf16.mxu0 %v3598_v12  ;;  %1620 = vmatprep.subr.bf16.mxu1 %v3600_v13  ;;  %v3628_v32 = vld [vmem:[#allocation2 + $0x104] ss:$16 sps:$4 sm:$0xff]   ;;  %v3630_v33 = vld [vmem:[#allocation2 + $0x10c] ss:$16 sps:$4 sm:$0xff]   ;;  %v3632_v34 = vld [vmem:[#allocation2 + $0x100] ss:$16 sps:$4 sm:$0xff]  }
  0x31   :  { %v3633_v35 = vld [vmem:[#allocation2 + $0x108] ss:$16 sps:$4 sm:$0xff]   ;;  %v3634_v36 = vld [vmem:[#allocation2 + $0x124] ss:$16 sps:$4 sm:$0xff]   ;;  %v3636_v37 = vld [vmem:[#allocation2 + $0x12c] ss:$16 sps:$4 sm:$0xff]  }
  0x32   :  { %v3638_v38 = vld [vmem:[#allocation2 + $0x120] ss:$16 sps:$4 sm:$0xff]   ;;  %v3639_v39 = vld [vmem:[#allocation2 + $0x128] ss:$16 sps:$4 sm:$0xff]   ;;  %v3640_v40 = vld [vmem:[#allocation2 + $0x144] ss:$16 sps:$4 sm:$0xff]  }
  0x33   :  { %1457 = vmatpush1.bf16.msra.mxu0 %v3602_v14  ;;  %1621 = vmatpush1.bf16.msra.mxu1 %v3603_v15  ;;  %v3642_v41 = vld [vmem:[#allocation2 + $0x14c] ss:$16 sps:$4 sm:$0xff]   ;;  %v3644_v42 = vld [vmem:[#allocation2 + $0x140] ss:$16 sps:$4 sm:$0xff]   ;;  %v3645_v43 = vld [vmem:[#allocation2 + $0x148] ss:$16 sps:$4 sm:$0xff]  }
  0x34   :  { %1458 = vmatprep.subr.bf16.mxu0 %v3604_v16  ;;  %1622 = vmatprep.subr.bf16.mxu1 %v3606_v17  ;;  %v3646_v44 = vld [vmem:[#allocation2 + $0x164] ss:$16 sps:$4 sm:$0xff]   ;;  %v3648_v45 = vld [vmem:[#allocation2 + $0x16c] ss:$16 sps:$4 sm:$0xff]   ;;  %v3650_v47 = vld [vmem:[#allocation2 + $0x160] ss:$16 sps:$4 sm:$0xff]  }
  0x35   :  { %v55_v46 = vld [vmem:[%s4427_s0] sm:$0xff]  ;;  %v3651_v49 = vld [vmem:[#allocation2 + $0x168] ss:$16 sps:$4 sm:$0xff]   ;;  %v3654_v51 = vld [vmem:[#allocation2 + $0x18c] ss:$16 sps:$4 sm:$0xff]  }
  0x36   :  { %v3100_v48 = vcombine.high %v55_v46, %v55_v46  ;;  %v3652_v50 = vld [vmem:[#allocation2 + $0x184] ss:$16 sps:$4 sm:$0xff]   ;;  %v3656_v52 = vld [vmem:[#allocation2 + $0x180] ss:$16 sps:$4 sm:$0xff]   ;;  %v3657_v53 = vld [vmem:[#allocation2 + $0x188] ss:$16 sps:$4 sm:$0xff]   ;;  %v3099_v4 = vcombine.low %v55_v46, %v55_v46 }
  0x37   :  { %1459 = vmatpush1.bf16.msra.mxu0 %v3608_v18  ;;  %1623 = vmatpush1.bf16.msra.mxu1 %v3609_v19  ;;  %v3658_v54 = vld [vmem:[#allocation2 + $0x1a4] ss:$16 sps:$4 sm:$0xff]   ;;  %v3660_v55 = vld [vmem:[#allocation2 + $0x1ac] ss:$16 sps:$4 sm:$0xff]   ;;  %v3662_v56 = vld [vmem:[#allocation2 + $0x1a0] ss:$16 sps:$4 sm:$0xff]  }
  0x38   :  { %1460 = vmatprep.subr.bf16.mxu0 %v3610_v20  ;;  %1624 = vmatprep.subr.bf16.mxu1 %v3612_v21  ;;  %v3663_v57 = vld [vmem:[#allocation2 + $0x1a8] ss:$16 sps:$4 sm:$0xff]   ;;  %v3664_v58 = vld [vmem:[#allocation2 + $0x1c4] ss:$16 sps:$4 sm:$0xff]   ;;  %v3666_v59 = vld [vmem:[#allocation2 + $0x1cc] ss:$16 sps:$4 sm:$0xff]  }
  0x39   :  { %1482 = vmatprep.mubr.bf16.mxu0 %v3100_v48  ;;  %1646 = vmatprep.mubr.bf16.mxu1 %v3100_v48  ;;  %v3668_v60 = vld [vmem:[#allocation2 + $0x1c0] ss:$16 sps:$4 sm:$0xff]   ;;  %v3669_v61 = vld [vmem:[#allocation2 + $0x1c8] ss:$16 sps:$4 sm:$0xff]   ;;  %v3670_v62 = vld [vmem:[#allocation2 + $0x1e4] ss:$16 sps:$4 sm:$0xff]  }
  0x3a   :  { %v3672_v63 = vld [vmem:[#allocation2 + $0x1ec] ss:$16 sps:$4 sm:$0xff]   ;;  %v3674_v0 = vld [vmem:[#allocation2 + $0x1e0] ss:$16 sps:$4 sm:$0xff]   ;;  %v3675_v1 = vld [vmem:[#allocation2 + $0x1e8] ss:$16 sps:$4 sm:$0xff]  }
  0x3b   :  { %1461 = vmatpush1.bf16.msra.mxu0 %v3614_v22  ;;  %1625 = vmatpush1.bf16.msra.mxu1 %v3615_v23  ;;  %v3680_v2 = vld [vmem:[#allocation2 + $0x204] ss:$16 sps:$4 sm:$0xff]   ;;  %v3683_v3 = vld [vmem:[#allocation2 + $0x20c] ss:$16 sps:$4 sm:$0xff]   ;;  %v3678_v5 = vld [vmem:[#allocation2 + $0x200] ss:$16 sps:$4 sm:$0xff]  }
  0x3c   :  { %1462 = vmatprep.subr.bf16.mxu0 %v3616_v24  ;;  %1626 = vmatprep.subr.bf16.mxu1 %v3618_v25  ;;  %v3681_v6 = vld [vmem:[#allocation2 + $0x208] ss:$16 sps:$4 sm:$0xff]   ;;  %v3686_v7 = vld [vmem:[#allocation2 + $0x224] ss:$16 sps:$4 sm:$0xff]   ;;  %v3689_v8 = vld [vmem:[#allocation2 + $0x22c] ss:$16 sps:$4 sm:$0xff]  }
  0x3d   :  { %v3684_v9 = vld [vmem:[#allocation2 + $0x220] ss:$16 sps:$4 sm:$0xff]   ;;  %v3687_v10 = vld [vmem:[#allocation2 + $0x228] ss:$16 sps:$4 sm:$0xff]   ;;  %v3692_v11 = vld [vmem:[#allocation2 + $0x244] ss:$16 sps:$4 sm:$0xff]  }
  0x3e   :  { %v3695_v12 = vld [vmem:[#allocation2 + $0x24c] ss:$16 sps:$4 sm:$0xff]   ;;  %v3690_v13 = vld [vmem:[#allocation2 + $0x240] ss:$16 sps:$4 sm:$0xff]   ;;  %v3693_v14 = vld [vmem:[#allocation2 + $0x248] ss:$16 sps:$4 sm:$0xff]  }
  0x3f   :  { %1463 = vmatpush1.bf16.msra.mxu0 %v3620_v26  ;;  %1627 = vmatpush1.bf16.msra.mxu1 %v3621_v27  ;;  %v3698_v15 = vld [vmem:[#allocation2 + $0x264] ss:$16 sps:$4 sm:$0xff]   ;;  %v3701_v16 = vld [vmem:[#allocation2 + $0x26c] ss:$16 sps:$4 sm:$0xff]   ;;  %v3696_v17 = vld [vmem:[#allocation2 + $0x260] ss:$16 sps:$4 sm:$0xff]  }
  0x40   :  { %1464 = vmatprep.subr.bf16.mxu0 %v3622_v28  ;;  %1628 = vmatprep.subr.bf16.mxu1 %v3624_v29  ;;  %v3699_v18 = vld [vmem:[#allocation2 + $0x268] ss:$16 sps:$4 sm:$0xff]   ;;  %v3704_v19 = vld [vmem:[#allocation2 + $0x284] ss:$16 sps:$4 sm:$0xff]   ;;  %v3707_v20 = vld [vmem:[#allocation2 + $0x28c] ss:$16 sps:$4 sm:$0xff]  }
  0x41   :  { %v3702_v21 = vld [vmem:[#allocation2 + $0x280] ss:$16 sps:$4 sm:$0xff]   ;;  %v3705_v22 = vld [vmem:[#allocation2 + $0x288] ss:$16 sps:$4 sm:$0xff]   ;;  %v3710_v23 = vld [vmem:[#allocation2 + $0x2a4] ss:$16 sps:$4 sm:$0xff]  }
  0x42   :  { %v3713_v24 = vld [vmem:[#allocation2 + $0x2ac] ss:$16 sps:$4 sm:$0xff]   ;;  %v3708_v25 = vld [vmem:[#allocation2 + $0x2a0] ss:$16 sps:$4 sm:$0xff]   ;;  %v3711_v26 = vld [vmem:[#allocation2 + $0x2a8] ss:$16 sps:$4 sm:$0xff]  }
  0x43   :  { %1465 = vmatpush1.bf16.msra.mxu0 %v3626_v30  ;;  %1629 = vmatpush1.bf16.msra.mxu1 %v3627_v31  ;;  %v3716_v27 = vld [vmem:[#allocation2 + $0x2c4] ss:$16 sps:$4 sm:$0xff]   ;;  %v3719_v28 = vld [vmem:[#allocation2 + $0x2cc] ss:$16 sps:$4 sm:$0xff]   ;;  %v3714_v31 = vld [vmem:[#allocation2 + $0x2c0] ss:$16 sps:$4 sm:$0xff]  }
  0x44   :  { %1466 = vmatprep.subr.bf16.mxu0 %v3628_v32  ;;  %1630 = vmatprep.subr.bf16.mxu1 %v3630_v33  ;;  %v4270_v29 = vld [vmem:[%s4427_s0 + $0x8] sm:$0xff]  ;;  %v3722_v33 = vld [vmem:[#allocation2 + $0x2e4] ss:$16 sps:$4 sm:$0xff]  }
  0x45   :  { %v3102_v30 = vcombine.high %v4270_v29, %v4270_v29  ;;  %v3717_v32 = vld [vmem:[#allocation2 + $0x2c8] ss:$16 sps:$4 sm:$0xff]   ;;  %v3743_v46 = vld [vmem:[#allocation2 + $0x34c] ss:$16 sps:$4 sm:$0xff]  }
  0x46   :  { %v3741_v48 = vld [vmem:[#allocation2 + $0x348] ss:$16 sps:$4 sm:$0xff]  }
  0x47   :  { %1467 = vmatpush1.bf16.msra.mxu0 %v3632_v34  ;;  %1631 = vmatpush1.bf16.msra.mxu1 %v3633_v35  ;;  %v3725_v34 = vld [vmem:[#allocation2 + $0x2ec] ss:$16 sps:$4 sm:$0xff]   ;;  %v3720_v35 = vld [vmem:[#allocation2 + $0x2e0] ss:$16 sps:$4 sm:$0xff]  }
  0x48   :  { %1468 = vmatprep.subr.bf16.mxu0 %v3634_v36  ;;  %1632 = vmatprep.subr.bf16.mxu1 %v3636_v37  ;;  %v3723_v36 = vld [vmem:[#allocation2 + $0x2e8] ss:$16 sps:$4 sm:$0xff]   ;;  %v3728_v37 = vld [vmem:[#allocation2 + $0x304] ss:$16 sps:$4 sm:$0xff]  }
  0x4b   :  { %1469 = vmatpush1.bf16.msra.mxu0 %v3638_v38  ;;  %1633 = vmatpush1.bf16.msra.mxu1 %v3639_v39  ;;  %v3731_v38 = vld [vmem:[#allocation2 + $0x30c] ss:$16 sps:$4 sm:$0xff]   ;;  %v3726_v39 = vld [vmem:[#allocation2 + $0x300] ss:$16 sps:$4 sm:$0xff]  }
  0x4c   :  { %1470 = vmatprep.subr.bf16.mxu0 %v3640_v40  ;;  %1634 = vmatprep.subr.bf16.mxu1 %v3642_v41  ;;  %v3729_v40 = vld [vmem:[#allocation2 + $0x308] ss:$16 sps:$4 sm:$0xff]   ;;  %v3734_v41 = vld [vmem:[#allocation2 + $0x324] ss:$16 sps:$4 sm:$0xff]  }
  0x4f   :  { %1471 = vmatpush1.bf16.msra.mxu0 %v3644_v42  ;;  %1635 = vmatpush1.bf16.msra.mxu1 %v3645_v43  ;;  %v3737_v42 = vld [vmem:[#allocation2 + $0x32c] ss:$16 sps:$4 sm:$0xff]   ;;  %v3732_v43 = vld [vmem:[#allocation2 + $0x320] ss:$16 sps:$4 sm:$0xff]  }
  0x50   :  { %1472 = vmatprep.subr.bf16.mxu0 %v3646_v44  ;;  %1636 = vmatprep.subr.bf16.mxu1 %v3648_v45  ;;  %v3735_v44 = vld [vmem:[#allocation2 + $0x328] ss:$16 sps:$4 sm:$0xff]   ;;  %v3740_v45 = vld [vmem:[#allocation2 + $0x344] ss:$16 sps:$4 sm:$0xff]  }
  0x53   :  { %1473 = vmatpush1.bf16.msra.mxu0 %v3650_v47  ;;  %1637 = vmatpush1.bf16.msra.mxu1 %v3651_v49  ;;  %v3738_v47 = vld [vmem:[#allocation2 + $0x340] ss:$16 sps:$4 sm:$0xff]   ;;  %v3746_v49 = vld [vmem:[#allocation2 + $0x364] ss:$16 sps:$4 sm:$0xff]  }
  0x54   :  { %1474 = vmatprep.subr.bf16.mxu0 %v3652_v50  ;;  %1638 = vmatprep.subr.bf16.mxu1 %v3654_v51  ;;  %v3749_v50 = vld [vmem:[#allocation2 + $0x36c] ss:$16 sps:$4 sm:$0xff]   ;;  %v3744_v51 = vld [vmem:[#allocation2 + $0x360] ss:$16 sps:$4 sm:$0xff]  }
  0x57   :  { %1475 = vmatpush1.bf16.msra.mxu0 %v3656_v52  ;;  %1639 = vmatpush1.bf16.msra.mxu1 %v3657_v53  ;;  %v3747_v52 = vld [vmem:[#allocation2 + $0x368] ss:$16 sps:$4 sm:$0xff]   ;;  %v3752_v53 = vld [vmem:[#allocation2 + $0x384] ss:$16 sps:$4 sm:$0xff]  }
  0x58   :  { %1476 = vmatprep.subr.bf16.mxu0 %v3658_v54  ;;  %1640 = vmatprep.subr.bf16.mxu1 %v3660_v55  ;;  %v3755_v54 = vld [vmem:[#allocation2 + $0x38c] ss:$16 sps:$4 sm:$0xff]   ;;  %v3750_v55 = vld [vmem:[#allocation2 + $0x380] ss:$16 sps:$4 sm:$0xff]  }
  0x5b   :  { %1477 = vmatpush1.bf16.msra.mxu0 %v3662_v56  ;;  %1641 = vmatpush1.bf16.msra.mxu1 %v3663_v57  ;;  %v3753_v56 = vld [vmem:[#allocation2 + $0x388] ss:$16 sps:$4 sm:$0xff]   ;;  %v3758_v57 = vld [vmem:[#allocation2 + $0x3a4] ss:$16 sps:$4 sm:$0xff]  }
  0x5c   :  { %1478 = vmatprep.subr.bf16.mxu0 %v3664_v58  ;;  %1642 = vmatprep.subr.bf16.mxu1 %v3666_v59  ;;  %v3761_v58 = vld [vmem:[#allocation2 + $0x3ac] ss:$16 sps:$4 sm:$0xff]   ;;  %v3756_v59 = vld [vmem:[#allocation2 + $0x3a0] ss:$16 sps:$4 sm:$0xff]  }
  0x5f   :  { %1479 = vmatpush1.bf16.msra.mxu0 %v3668_v60  ;;  %1643 = vmatpush1.bf16.msra.mxu1 %v3669_v61  ;;  %v3759_v60 = vld [vmem:[#allocation2 + $0x3a8] ss:$16 sps:$4 sm:$0xff]   ;;  %v3764_v61 = vld [vmem:[#allocation2 + $0x3c4] ss:$16 sps:$4 sm:$0xff]  }
  0x60   :  { %1480 = vmatprep.subr.bf16.mxu0 %v3670_v62  ;;  %1644 = vmatprep.subr.bf16.mxu1 %v3672_v63  ;;  %v3767_v62 = vld [vmem:[#allocation2 + $0x3cc] ss:$16 sps:$4 sm:$0xff]   ;;  %v3762_v63 = vld [vmem:[#allocation2 + $0x3c0] ss:$16 sps:$4 sm:$0xff]  }
  0x63   :  { %1481 = vmatpush1.bf16.msra.mxu0 %v3674_v0  ;;  %1645 = vmatpush1.bf16.msra.mxu1 %v3675_v1  ;;  %v3765_v0 = vld [vmem:[#allocation2 + $0x3c8] ss:$16 sps:$4 sm:$0xff]   ;;  %v3770_v1 = vld [vmem:[#allocation2 + $0x3e4] ss:$16 sps:$4 sm:$0xff]  }
  0x64   :  { %1491 = vmatprep.subr.bf16.mxu0 %v3680_v2  ;;  %1655 = vmatprep.subr.bf16.mxu1 %v3683_v3  ;;  %v3773_v2 = vld [vmem:[#allocation2 + $0x3ec] ss:$16 sps:$4 sm:$0xff]   ;;  %v3768_v3 = vld [vmem:[#allocation2 + $0x3e0] ss:$16 sps:$4 sm:$0xff]  }
  0x66   :  { %1483 = vmatmul.mubr.bf16.vlgmr.msra.gmra.mrb[0].mxu0 %v3099_v4  ;;  %1647 = vmatmul.mubr.bf16.vlgmr.msra.gmra.mrb[0].mxu1 %v3099_v4  ;;  %v3771_v4 = vld [vmem:[#allocation2 + $0x3e8] ss:$16 sps:$4 sm:$0xff]  }
  0x67   :  { %1492 = vmatpush1.bf16.msra.mxu0 %v3678_v5  ;;  %1656 = vmatpush1.bf16.msra.mxu1 %v3681_v6  ;;  %v3778_v5 = vld [vmem:[#allocation2 + $0x404] ss:$16 sps:$4 sm:$0xff]   ;;  %v3781_v6 = vld [vmem:[#allocation2 + $0x40c] ss:$16 sps:$4 sm:$0xff]  }
  0x68   :  { %1493 = vmatprep.subr.bf16.mxu0 %v3686_v7  ;;  %1657 = vmatprep.subr.bf16.mxu1 %v3689_v8  ;;  %v3101_v7 = vcombine.low %v4270_v29, %v4270_v29  ;;  %v3776_v8 = vld [vmem:[#allocation2 + $0x400] ss:$16 sps:$4 sm:$0xff]   ;;  %v3811_v29 = vld [vmem:[#allocation2 + $0x4ac] ss:$16 sps:$4 sm:$0xff]  }
  0x69   :  { %1523 = vmatprep.mubr.bf16.mxu0 %v3102_v30  ;;  %1687 = vmatprep.mubr.bf16.mxu1 %v3102_v30  ;;  %v3806_v30 = vld [vmem:[#allocation2 + $0x4a0] ss:$16 sps:$4 sm:$0xff]  }
  0x6b   :  { %1494 = vmatpush1.bf16.msra.mxu0 %v3684_v9  ;;  %1658 = vmatpush1.bf16.msra.mxu1 %v3687_v10  ;;  %v3779_v9 = vld [vmem:[#allocation2 + $0x408] ss:$16 sps:$4 sm:$0xff]   ;;  %v3784_v10 = vld [vmem:[#allocation2 + $0x424] ss:$16 sps:$4 sm:$0xff]  }
  0x6c   :  { %1495 = vmatprep.subr.bf16.mxu0 %v3692_v11  ;;  %1659 = vmatprep.subr.bf16.mxu1 %v3695_v12  ;;  %v4279_v11 = vld [vmem:[%s4427_s0 + $0x10] sm:$0xff]  ;;  %v3787_v12 = vld [vmem:[#allocation2 + $0x42c] ss:$16 sps:$4 sm:$0xff]  }
  0x6f   :  { %1496 = vmatpush1.bf16.msra.mxu0 %v3690_v13  ;;  %1660 = vmatpush1.bf16.msra.mxu1 %v3693_v14  ;;  %v3104_v13 = vcombine.high %v4279_v11, %v4279_v11  ;;  %v3782_v14 = vld [vmem:[#allocation2 + $0x420] ss:$16 sps:$4 sm:$0xff]  }
  0x70   :  { %1497 = vmatprep.subr.bf16.mxu0 %v3698_v15  ;;  %1661 = vmatprep.subr.bf16.mxu1 %v3701_v16  ;;  %v3785_v15 = vld [vmem:[#allocation2 + $0x428] ss:$16 sps:$4 sm:$0xff]   ;;  %v3790_v16 = vld [vmem:[#allocation2 + $0x444] ss:$16 sps:$4 sm:$0xff]  }
  0x73   :  { %1498 = vmatpush1.bf16.msra.mxu0 %v3696_v17  ;;  %1662 = vmatpush1.bf16.msra.mxu1 %v3699_v18  ;;  %v3793_v17 = vld [vmem:[#allocation2 + $0x44c] ss:$16 sps:$4 sm:$0xff]   ;;  %v3788_v18 = vld [vmem:[#allocation2 + $0x440] ss:$16 sps:$4 sm:$0xff]  }
  0x74   :  { %1499 = vmatprep.subr.bf16.mxu0 %v3704_v19  ;;  %1663 = vmatprep.subr.bf16.mxu1 %v3707_v20  ;;  %v3791_v19 = vld [vmem:[#allocation2 + $0x448] ss:$16 sps:$4 sm:$0xff]   ;;  %v3796_v20 = vld [vmem:[#allocation2 + $0x464] ss:$16 sps:$4 sm:$0xff]  }
  0x77   :  { %1500 = vmatpush1.bf16.msra.mxu0 %v3702_v21  ;;  %1664 = vmatpush1.bf16.msra.mxu1 %v3705_v22  ;;  %v3799_v21 = vld [vmem:[#allocation2 + $0x46c] ss:$16 sps:$4 sm:$0xff]   ;;  %v3794_v22 = vld [vmem:[#allocation2 + $0x460] ss:$16 sps:$4 sm:$0xff]  }
  0x78   :  { %1501 = vmatprep.subr.bf16.mxu0 %v3710_v23  ;;  %1665 = vmatprep.subr.bf16.mxu1 %v3713_v24  ;;  %v3797_v23 = vld [vmem:[#allocation2 + $0x468] ss:$16 sps:$4 sm:$0xff]   ;;  %v3802_v24 = vld [vmem:[#allocation2 + $0x484] ss:$16 sps:$4 sm:$0xff]  }
  0x7b   :  { %1502 = vmatpush1.bf16.msra.mxu0 %v3708_v25  ;;  %1666 = vmatpush1.bf16.msra.mxu1 %v3711_v26  ;;  %v3805_v25 = vld [vmem:[#allocation2 + $0x48c] ss:$16 sps:$4 sm:$0xff]   ;;  %v3800_v26 = vld [vmem:[#allocation2 + $0x480] ss:$16 sps:$4 sm:$0xff]  }
  0x7c   :  { %1503 = vmatprep.subr.bf16.mxu0 %v3716_v27  ;;  %1667 = vmatprep.subr.bf16.mxu1 %v3719_v28  ;;  %v3803_v27 = vld [vmem:[#allocation2 + $0x488] ss:$16 sps:$4 sm:$0xff]   ;;  %v3808_v28 = vld [vmem:[#allocation2 + $0x4a4] ss:$16 sps:$4 sm:$0xff]  }
  0x7f   :  { %1504 = vmatpush1.bf16.msra.mxu0 %v3714_v31  ;;  %1668 = vmatpush1.bf16.msra.mxu1 %v3717_v32  ;;  %v3809_v31 = vld [vmem:[#allocation2 + $0x4a8] ss:$16 sps:$4 sm:$0xff]   ;;  %v3814_v32 = vld [vmem:[#allocation2 + $0x4c4] ss:$16 sps:$4 sm:$0xff]  }
  0x80   :  { %1505 = vmatprep.subr.bf16.mxu0 %v3722_v33  ;;  %1669 = vmatprep.subr.bf16.mxu1 %v3725_v34  ;;  %v3817_v33 = vld [vmem:[#allocation2 + $0x4cc] ss:$16 sps:$4 sm:$0xff]   ;;  %v3812_v34 = vld [vmem:[#allocation2 + $0x4c0] ss:$16 sps:$4 sm:$0xff]  }
  0x83   :  { %1506 = vmatpush1.bf16.msra.mxu0 %v3720_v35  ;;  %1670 = vmatpush1.bf16.msra.mxu1 %v3723_v36  ;;  %v3815_v35 = vld [vmem:[#allocation2 + $0x4c8] ss:$16 sps:$4 sm:$0xff]   ;;  %v3820_v36 = vld [vmem:[#allocation2 + $0x4e4] ss:$16 sps:$4 sm:$0xff]  }
  0x84   :  { %1507 = vmatprep.subr.bf16.mxu0 %v3728_v37  ;;  %1671 = vmatprep.subr.bf16.mxu1 %v3731_v38  ;;  %v3823_v37 = vld [vmem:[#allocation2 + $0x4ec] ss:$16 sps:$4 sm:$0xff]   ;;  %v3818_v38 = vld [vmem:[#allocation2 + $0x4e0] ss:$16 sps:$4 sm:$0xff]  }
  0x87   :  { %1508 = vmatpush1.bf16.msra.mxu0 %v3726_v39  ;;  %1672 = vmatpush1.bf16.msra.mxu1 %v3729_v40  ;;  %v3821_v39 = vld [vmem:[#allocation2 + $0x4e8] ss:$16 sps:$4 sm:$0xff]   ;;  %v3826_v40 = vld [vmem:[#allocation2 + $0x504] ss:$16 sps:$4 sm:$0xff]  }
  0x88   :  { %1509 = vmatprep.subr.bf16.mxu0 %v3734_v41  ;;  %1673 = vmatprep.subr.bf16.mxu1 %v3737_v42  ;;  %v3829_v41 = vld [vmem:[#allocation2 + $0x50c] ss:$16 sps:$4 sm:$0xff]   ;;  %v3824_v42 = vld [vmem:[#allocation2 + $0x500] ss:$16 sps:$4 sm:$0xff]  }
  0x8b   :  { %1510 = vmatpush1.bf16.msra.mxu0 %v3732_v43  ;;  %1674 = vmatpush1.bf16.msra.mxu1 %v3735_v44  ;;  %v3827_v43 = vld [vmem:[#allocation2 + $0x508] ss:$16 sps:$4 sm:$0xff]   ;;  %v3832_v44 = vld [vmem:[#allocation2 + $0x524] ss:$16 sps:$4 sm:$0xff]  }
  0x8c   :  { %1511 = vmatprep.subr.bf16.mxu0 %v3740_v45  ;;  %1675 = vmatprep.subr.bf16.mxu1 %v3743_v46  ;;  %v3835_v45 = vld [vmem:[#allocation2 + $0x52c] ss:$16 sps:$4 sm:$0xff]   ;;  %v3830_v46 = vld [vmem:[#allocation2 + $0x520] ss:$16 sps:$4 sm:$0xff]  }
  0x8f   :  { %1512 = vmatpush1.bf16.msra.mxu0 %v3738_v47  ;;  %1676 = vmatpush1.bf16.msra.mxu1 %v3741_v48  ;;  %v3833_v47 = vld [vmem:[#allocation2 + $0x528] ss:$16 sps:$4 sm:$0xff]   ;;  %v3838_v48 = vld [vmem:[#allocation2 + $0x544] ss:$16 sps:$4 sm:$0xff]  }
  0x90   :  { %1513 = vmatprep.subr.bf16.mxu0 %v3746_v49  ;;  %1677 = vmatprep.subr.bf16.mxu1 %v3749_v50  ;;  %v3841_v49 = vld [vmem:[#allocation2 + $0x54c] ss:$16 sps:$4 sm:$0xff]   ;;  %v3836_v50 = vld [vmem:[#allocation2 + $0x540] ss:$16 sps:$4 sm:$0xff]  }
  0x93   :  { %1514 = vmatpush1.bf16.msra.mxu0 %v3744_v51  ;;  %1678 = vmatpush1.bf16.msra.mxu1 %v3747_v52  ;;  %v3839_v51 = vld [vmem:[#allocation2 + $0x548] ss:$16 sps:$4 sm:$0xff]   ;;  %v3844_v52 = vld [vmem:[#allocation2 + $0x564] ss:$16 sps:$4 sm:$0xff]  }
  0x94   :  { %1515 = vmatprep.subr.bf16.mxu0 %v3752_v53  ;;  %1679 = vmatprep.subr.bf16.mxu1 %v3755_v54  ;;  %v3847_v53 = vld [vmem:[#allocation2 + $0x56c] ss:$16 sps:$4 sm:$0xff]   ;;  %v3842_v54 = vld [vmem:[#allocation2 + $0x560] ss:$16 sps:$4 sm:$0xff]  }
  0x97   :  { %1516 = vmatpush1.bf16.msra.mxu0 %v3750_v55  ;;  %1680 = vmatpush1.bf16.msra.mxu1 %v3753_v56  ;;  %v3845_v55 = vld [vmem:[#allocation2 + $0x568] ss:$16 sps:$4 sm:$0xff]   ;;  %v3850_v56 = vld [vmem:[#allocation2 + $0x584] ss:$16 sps:$4 sm:$0xff]  }
  0x98   :  { %1517 = vmatprep.subr.bf16.mxu0 %v3758_v57  ;;  %1681 = vmatprep.subr.bf16.mxu1 %v3761_v58  ;;  %v3853_v57 = vld [vmem:[#allocation2 + $0x58c] ss:$16 sps:$4 sm:$0xff]   ;;  %v3848_v58 = vld [vmem:[#allocation2 + $0x580] ss:$16 sps:$4 sm:$0xff]  }
  0x9b   :  { %1518 = vmatpush1.bf16.msra.mxu0 %v3756_v59  ;;  %1682 = vmatpush1.bf16.msra.mxu1 %v3759_v60  ;;  %v3851_v59 = vld [vmem:[#allocation2 + $0x588] ss:$16 sps:$4 sm:$0xff]   ;;  %v3856_v60 = vld [vmem:[#allocation2 + $0x5a4] ss:$16 sps:$4 sm:$0xff]  }
  0x9c   :  { %1519 = vmatprep.subr.bf16.mxu0 %v3764_v61  ;;  %1683 = vmatprep.subr.bf16.mxu1 %v3767_v62  ;;  %v3859_v61 = vld [vmem:[#allocation2 + $0x5ac] ss:$16 sps:$4 sm:$0xff]   ;;  %v3854_v62 = vld [vmem:[#allocation2 + $0x5a0] ss:$16 sps:$4 sm:$0xff]  }
  0x9f   :  { %1520 = vmatpush1.bf16.msra.mxu0 %v3762_v63  ;;  %1684 = vmatpush1.bf16.msra.mxu1 %v3765_v0  ;;  %v3857_v63 = vld [vmem:[#allocation2 + $0x5a8] ss:$16 sps:$4 sm:$0xff]   ;;  %v3862_v0 = vld [vmem:[#allocation2 + $0x5c4] ss:$16 sps:$4 sm:$0xff]  }
  0xa0   :  { %1521 = vmatprep.subr.bf16.mxu0 %v3770_v1  ;;  %1685 = vmatprep.subr.bf16.mxu1 %v3773_v2  ;;  %v3865_v1 = vld [vmem:[#allocation2 + $0x5cc] ss:$16 sps:$4 sm:$0xff]   ;;  %v3860_v2 = vld [vmem:[#allocation2 + $0x5c0] ss:$16 sps:$4 sm:$0xff]  }
  0xa3   :  { %1522 = vmatpush1.bf16.msra.mxu0 %v3768_v3  ;;  %1686 = vmatpush1.bf16.msra.mxu1 %v3771_v4  ;;  %v3863_v3 = vld [vmem:[#allocation2 + $0x5c8] ss:$16 sps:$4 sm:$0xff]   ;;  %v3868_v4 = vld [vmem:[#allocation2 + $0x5e4] ss:$16 sps:$4 sm:$0xff]  }
  0xa4   :  { %1532 = vmatprep.subr.bf16.mxu0 %v3778_v5  ;;  %1696 = vmatprep.subr.bf16.mxu1 %v3781_v6  ;;  %v3871_v5 = vld [vmem:[#allocation2 + $0x5ec] ss:$16 sps:$4 sm:$0xff]   ;;  %v3866_v6 = vld [vmem:[#allocation2 + $0x5e0] ss:$16 sps:$4 sm:$0xff]  }
  0xa6   :  { %1524 = vmatmul.mubr.bf16.vlgmr.msra.gmra.mrb[0].mxu0 %v3101_v7  ;;  %1688 = vmatmul.mubr.bf16.vlgmr.msra.gmra.mrb[0].mxu1 %v3101_v7  ;;  %v3869_v7 = vld [vmem:[#allocation2 + $0x5e8] ss:$16 sps:$4 sm:$0xff]  }
  0xa7   :  { %1533 = vmatpush1.bf16.msra.mxu0 %v3776_v8  ;;  %1697 = vmatpush1.bf16.msra.mxu1 %v3779_v9  ;;  %v3876_v8 = vld [vmem:[#allocation2 + $0x604] ss:$16 sps:$4 sm:$0xff]   ;;  %v3879_v9 = vld [vmem:[#allocation2 + $0x60c] ss:$16 sps:$4 sm:$0xff]  }
  0xa8   :  { %1534 = vmatprep.subr.bf16.mxu0 %v3784_v10  ;;  %1698 = vmatprep.subr.bf16.mxu1 %v3787_v12  ;;  %v3874_v10 = vld [vmem:[#allocation2 + $0x600] ss:$16 sps:$4 sm:$0xff]   ;;  %v3877_v12 = vld [vmem:[#allocation2 + $0x608] ss:$16 sps:$4 sm:$0xff]  }
  0xa9   :  { %1564 = vmatprep.mubr.bf16.mxu0 %v3104_v13  ;;  %1728 = vmatprep.mubr.bf16.mxu1 %v3104_v13  ;;  %v3103_v13 = vcombine.low %v4279_v11, %v4279_v11  ;;  %v3894_v11 = vld [vmem:[#allocation2 + $0x664] ss:$16 sps:$4 sm:$0xff]  }
  0xab   :  { %1535 = vmatpush1.bf16.msra.mxu0 %v3782_v14  ;;  %1699 = vmatpush1.bf16.msra.mxu1 %v3785_v15  ;;  %v3882_v14 = vld [vmem:[#allocation2 + $0x624] ss:$16 sps:$4 sm:$0xff]   ;;  %v3885_v15 = vld [vmem:[#allocation2 + $0x62c] ss:$16 sps:$4 sm:$0xff]  }
  0xac   :  { %1536 = vmatprep.subr.bf16.mxu0 %v3790_v16  ;;  %1700 = vmatprep.subr.bf16.mxu1 %v3793_v17  ;;  %v3880_v16 = vld [vmem:[#allocation2 + $0x620] ss:$16 sps:$4 sm:$0xff]   ;;  %v3883_v17 = vld [vmem:[#allocation2 + $0x628] ss:$16 sps:$4 sm:$0xff]  }
  0xaf   :  { %1537 = vmatpush1.bf16.msra.mxu0 %v3788_v18  ;;  %1701 = vmatpush1.bf16.msra.mxu1 %v3791_v19  ;;  %v3888_v18 = vld [vmem:[#allocation2 + $0x644] ss:$16 sps:$4 sm:$0xff]   ;;  %v3891_v19 = vld [vmem:[#allocation2 + $0x64c] ss:$16 sps:$4 sm:$0xff]  }
  0xb0   :  { %1538 = vmatprep.subr.bf16.mxu0 %v3796_v20  ;;  %1702 = vmatprep.subr.bf16.mxu1 %v3799_v21  ;;  %v3886_v20 = vld [vmem:[#allocation2 + $0x640] ss:$16 sps:$4 sm:$0xff]   ;;  %v3889_v21 = vld [vmem:[#allocation2 + $0x648] ss:$16 sps:$4 sm:$0xff]  }
  0xb3   :  { %1539 = vmatpush1.bf16.msra.mxu0 %v3794_v22  ;;  %1703 = vmatpush1.bf16.msra.mxu1 %v3797_v23  ;;  %v4199_v22 = vmov 0   ;;  %v3897_v23 = vld [vmem:[#allocation2 + $0x66c] ss:$16 sps:$4 sm:$0xff]  }
  0xb4   :  { %1540 = vmatprep.subr.bf16.mxu0 %v3802_v24  ;;  %1704 = vmatprep.subr.bf16.mxu1 %v3805_v25  ;;  %v3892_v24 = vld [vmem:[#allocation2 + $0x660] ss:$16 sps:$4 sm:$0xff]   ;;  %v3895_v25 = vld [vmem:[#allocation2 + $0x668] ss:$16 sps:$4 sm:$0xff]  }
  0xb7   :  { %1541 = vmatpush1.bf16.msra.mxu0 %v3800_v26  ;;  %1705 = vmatpush1.bf16.msra.mxu1 %v3803_v27  ;;  %v3900_v26 = vld [vmem:[#allocation2 + $0x684] ss:$16 sps:$4 sm:$0xff]   ;;  %v3903_v27 = vld [vmem:[#allocation2 + $0x68c] ss:$16 sps:$4 sm:$0xff]  }
  0xb8   :  { %1542 = vmatprep.subr.bf16.mxu0 %v3808_v28  ;;  %1706 = vmatprep.subr.bf16.mxu1 %v3811_v29  ;;  %v3898_v28 = vld [vmem:[#allocation2 + $0x680] ss:$16 sps:$4 sm:$0xff]   ;;  %v3901_v29 = vld [vmem:[#allocation2 + $0x688] ss:$16 sps:$4 sm:$0xff]  }
  0xbb   :  { %1543 = vmatpush1.bf16.msra.mxu0 %v3806_v30  ;;  %1707 = vmatpush1.bf16.msra.mxu1 %v3809_v31  ;;  %v3906_v30 = vld [vmem:[#allocation2 + $0x6a4] ss:$16 sps:$4 sm:$0xff]   ;;  %v3909_v31 = vld [vmem:[#allocation2 + $0x6ac] ss:$16 sps:$4 sm:$0xff]  }
  0xbc   :  { %1544 = vmatprep.subr.bf16.mxu0 %v3814_v32  ;;  %1708 = vmatprep.subr.bf16.mxu1 %v3817_v33  ;;  %v3904_v32 = vld [vmem:[#allocation2 + $0x6a0] ss:$16 sps:$4 sm:$0xff]   ;;  %v3907_v33 = vld [vmem:[#allocation2 + $0x6a8] ss:$16 sps:$4 sm:$0xff]  }
  0xbf   :  { %1545 = vmatpush1.bf16.msra.mxu0 %v3812_v34  ;;  %1709 = vmatpush1.bf16.msra.mxu1 %v3815_v35  ;;  %v3912_v34 = vld [vmem:[#allocation2 + $0x6c4] ss:$16 sps:$4 sm:$0xff]   ;;  %v3915_v35 = vld [vmem:[#allocation2 + $0x6cc] ss:$16 sps:$4 sm:$0xff]  }
  0xc0   :  { %1546 = vmatprep.subr.bf16.mxu0 %v3820_v36  ;;  %1710 = vmatprep.subr.bf16.mxu1 %v3823_v37  ;;  %v3910_v36 = vld [vmem:[#allocation2 + $0x6c0] ss:$16 sps:$4 sm:$0xff]   ;;  %v3913_v37 = vld [vmem:[#allocation2 + $0x6c8] ss:$16 sps:$4 sm:$0xff]  }
  0xc3   :  { %1547 = vmatpush1.bf16.msra.mxu0 %v3818_v38  ;;  %1711 = vmatpush1.bf16.msra.mxu1 %v3821_v39  ;;  %v3918_v38 = vld [vmem:[#allocation2 + $0x6e4] ss:$16 sps:$4 sm:$0xff]   ;;  %v3921_v39 = vld [vmem:[#allocation2 + $0x6ec] ss:$16 sps:$4 sm:$0xff]  }
  0xc4   :  { %1548 = vmatprep.subr.bf16.mxu0 %v3826_v40  ;;  %1712 = vmatprep.subr.bf16.mxu1 %v3829_v41  ;;  %v3916_v40 = vld [vmem:[#allocation2 + $0x6e0] ss:$16 sps:$4 sm:$0xff]   ;;  %v3919_v41 = vld [vmem:[#allocation2 + $0x6e8] ss:$16 sps:$4 sm:$0xff]  }
  0xc7   :  { %1549 = vmatpush1.bf16.msra.mxu0 %v3824_v42  ;;  %1713 = vmatpush1.bf16.msra.mxu1 %v3827_v43  ;;  %v3925_v42 = vld [vmem:[#allocation4 + $0x4] ss:$16 sps:$4 sm:$0xff]   ;;  %v3928_v43 = vld [vmem:[#allocation4 + $0xc] ss:$16 sps:$4 sm:$0xff]  }
  0xc8   :  { %1550 = vmatprep.subr.bf16.mxu0 %v3832_v44  ;;  %1714 = vmatprep.subr.bf16.mxu1 %v3835_v45  ;;  %v3922_v44 = vld [vmem:[%s4427_s0 + $0x18] ss:$0 sps:$4 sm:$0xff]   ;;  %v3923_v45 = vld [vmem:[#allocation4] ss:$16 sps:$4 sm:$0xff]  }
  0xcb   :  { %1551 = vmatpush1.bf16.msra.mxu0 %v3830_v46  ;;  %1715 = vmatpush1.bf16.msra.mxu1 %v3833_v47  ;;  %v3926_v46 = vld [vmem:[#allocation4 + $0x8] ss:$16 sps:$4 sm:$0xff]   ;;  %v3931_v47 = vld [vmem:[#allocation4 + $0x24] ss:$16 sps:$4 sm:$0xff]  }
  0xcc   :  { %1552 = vmatprep.subr.bf16.mxu0 %v3838_v48  ;;  %1716 = vmatprep.subr.bf16.mxu1 %v3841_v49  ;;  %v3934_v48 = vld [vmem:[#allocation4 + $0x2c] ss:$16 sps:$4 sm:$0xff]   ;;  %v3929_v49 = vld [vmem:[#allocation4 + $0x20] ss:$16 sps:$4 sm:$0xff]  }
  0xcf   :  { %1553 = vmatpush1.bf16.msra.mxu0 %v3836_v50  ;;  %1717 = vmatpush1.bf16.msra.mxu1 %v3839_v51  ;;  %v3932_v50 = vld [vmem:[#allocation4 + $0x28] ss:$16 sps:$4 sm:$0xff]   ;;  %v3937_v51 = vld [vmem:[#allocation4 + $0x44] ss:$16 sps:$4 sm:$0xff]  }
  0xd0   :  { %1554 = vmatprep.subr.bf16.mxu0 %v3844_v52  ;;  %1718 = vmatprep.subr.bf16.mxu1 %v3847_v53  ;;  %v3940_v52 = vld [vmem:[#allocation4 + $0x4c] ss:$16 sps:$4 sm:$0xff]   ;;  %v3935_v53 = vld [vmem:[#allocation4 + $0x40] ss:$16 sps:$4 sm:$0xff]  }
  0xd3   :  { %1555 = vmatpush1.bf16.msra.mxu0 %v3842_v54  ;;  %1719 = vmatpush1.bf16.msra.mxu1 %v3845_v55  ;;  %v3938_v54 = vld [vmem:[#allocation4 + $0x48] ss:$16 sps:$4 sm:$0xff]   ;;  %v3943_v55 = vld [vmem:[#allocation4 + $0x64] ss:$16 sps:$4 sm:$0xff]  }
  0xd4   :  { %1556 = vmatprep.subr.bf16.mxu0 %v3850_v56  ;;  %1720 = vmatprep.subr.bf16.mxu1 %v3853_v57  ;;  %v3946_v56 = vld [vmem:[#allocation4 + $0x6c] ss:$16 sps:$4 sm:$0xff]   ;;  %v3941_v57 = vld [vmem:[#allocation4 + $0x60] ss:$16 sps:$4 sm:$0xff]  }
  0xd7   :  { %1557 = vmatpush1.bf16.msra.mxu0 %v3848_v58  ;;  %1721 = vmatpush1.bf16.msra.mxu1 %v3851_v59  ;;  %v3944_v58 = vld [vmem:[#allocation4 + $0x68] ss:$16 sps:$4 sm:$0xff]   ;;  %v3949_v59 = vld [vmem:[#allocation4 + $0x84] ss:$16 sps:$4 sm:$0xff]  }
  0xd8   :  { %1558 = vmatprep.subr.bf16.mxu0 %v3856_v60  ;;  %1722 = vmatprep.subr.bf16.mxu1 %v3859_v61  ;;  %v3952_v60 = vld [vmem:[#allocation4 + $0x8c] ss:$16 sps:$4 sm:$0xff]   ;;  %v3947_v61 = vld [vmem:[#allocation4 + $0x80] ss:$16 sps:$4 sm:$0xff]  }
  0xdb   :  { %1559 = vmatpush1.bf16.msra.mxu0 %v3854_v62  ;;  %1723 = vmatpush1.bf16.msra.mxu1 %v3857_v63  ;;  %v3950_v62 = vld [vmem:[#allocation4 + $0x88] ss:$16 sps:$4 sm:$0xff]   ;;  %v3955_v63 = vld [vmem:[#allocation4 + $0xa4] ss:$16 sps:$4 sm:$0xff]  }
  0xdc   :  { %1560 = vmatprep.subr.bf16.mxu0 %v3862_v0  ;;  %1724 = vmatprep.subr.bf16.mxu1 %v3865_v1  ;;  %v3958_v0 = vld [vmem:[#allocation4 + $0xac] ss:$16 sps:$4 sm:$0xff]   ;;  %v3953_v1 = vld [vmem:[#allocation4 + $0xa0] ss:$16 sps:$4 sm:$0xff]  }
  0xdf   :  { %1561 = vmatpush1.bf16.msra.mxu0 %v3860_v2  ;;  %1725 = vmatpush1.bf16.msra.mxu1 %v3863_v3  ;;  %v3956_v2 = vld [vmem:[#allocation4 + $0xa8] ss:$16 sps:$4 sm:$0xff]   ;;  %v3961_v3 = vld [vmem:[#allocation4 + $0xc4] ss:$16 sps:$4 sm:$0xff]  }
  0xe0   :  { %1562 = vmatprep.subr.bf16.mxu0 %v3868_v4  ;;  %1726 = vmatprep.subr.bf16.mxu1 %v3871_v5  ;;  %v3964_v4 = vld [vmem:[#allocation4 + $0xcc] ss:$16 sps:$4 sm:$0xff]   ;;  %v3959_v5 = vld [vmem:[#allocation4 + $0xc0] ss:$16 sps:$4 sm:$0xff]  }
  0xe3   :  { %1563 = vmatpush1.bf16.msra.mxu0 %v3866_v6  ;;  %1727 = vmatpush1.bf16.msra.mxu1 %v3869_v7  ;;  %v3962_v6 = vld [vmem:[#allocation4 + $0xc8] ss:$16 sps:$4 sm:$0xff]   ;;  %v3967_v7 = vld [vmem:[#allocation4 + $0xe4] ss:$16 sps:$4 sm:$0xff]  }
  0xe4   :  { %1573 = vmatprep.subr.bf16.mxu0 %v3876_v8  ;;  %1737 = vmatprep.subr.bf16.mxu1 %v3879_v9  ;;  %v3970_v8 = vld [vmem:[#allocation4 + $0xec] ss:$16 sps:$4 sm:$0xff]   ;;  %v3965_v9 = vld [vmem:[#allocation4 + $0xe0] ss:$16 sps:$4 sm:$0xff]  }
  0xe6   :  { %1565 = vmatmul.mubr.bf16.vlgmr.msra.gmra.mrb[0].mxu0 %v3103_v13  ;;  %1729 = vmatmul.mubr.bf16.vlgmr.msra.gmra.mrb[0].mxu1 %v3103_v13  ;;  %v3976_v13 = vld [vmem:[#allocation4 + $0x10c] ss:$16 sps:$4 sm:$0xff]  }
  0xe7   :  { %1574 = vmatpush1.bf16.msra.mxu0 %v3874_v10  ;;  %1738 = vmatpush1.bf16.msra.mxu1 %v3877_v12  ;;  %v3968_v10 = vld [vmem:[#allocation4 + $0xe8] ss:$16 sps:$4 sm:$0xff]   ;;  %v3973_v12 = vld [vmem:[#allocation4 + $0x104] ss:$16 sps:$4 sm:$0xff]  }
  0xe8   :  { %1575 = vmatprep.subr.bf16.mxu0 %v3882_v14  ;;  %1739 = vmatprep.subr.bf16.mxu1 %v3885_v15  ;;  %v3971_v14 = vld [vmem:[#allocation4 + $0x100] ss:$16 sps:$4 sm:$0xff]   ;;  %v3974_v15 = vld [vmem:[#allocation4 + $0x108] ss:$16 sps:$4 sm:$0xff]  }
  0xe9   :  { %1605 = vmatprep.mubr.bf16.mxu0 %v4199_v22  ;;  %1769 = vmatprep.mubr.bf16.mxu1 %v4199_v22  ;;  %v3983_v22 = vld [vmem:[#allocation4 + $0x140] ss:$16 sps:$4 sm:$0xff]  }
  0xeb   :  { %1576 = vmatpush1.bf16.msra.mxu0 %v3880_v16  ;;  %1740 = vmatpush1.bf16.msra.mxu1 %v3883_v17  ;;  %v3979_v16 = vld [vmem:[#allocation4 + $0x124] ss:$16 sps:$4 sm:$0xff]   ;;  %v3982_v17 = vld [vmem:[#allocation4 + $0x12c] ss:$16 sps:$4 sm:$0xff]  }
  0xec   :  { %1577 = vmatprep.subr.bf16.mxu0 %v3888_v18  ;;  %1741 = vmatprep.subr.bf16.mxu1 %v3891_v19  ;;  %v3977_v18 = vld [vmem:[#allocation4 + $0x120] ss:$16 sps:$4 sm:$0xff]   ;;  %v3980_v19 = vld [vmem:[#allocation4 + $0x128] ss:$16 sps:$4 sm:$0xff]  }
  0xef   :  { %1578 = vmatpush1.bf16.msra.mxu0 %v3886_v20  ;;  %1742 = vmatpush1.bf16.msra.mxu1 %v3889_v21  ;;  %v3985_v20 = vld [vmem:[#allocation4 + $0x144] ss:$16 sps:$4 sm:$0xff]   ;;  %v3988_v21 = vld [vmem:[#allocation4 + $0x14c] ss:$16 sps:$4 sm:$0xff]  }
  0xf0   :  { %1579 = vmatprep.subr.bf16.mxu0 %v3894_v11  ;;  %1743 = vmatprep.subr.bf16.mxu1 %v3897_v23  ;;  %v3986_v11 = vld [vmem:[#allocation4 + $0x148] ss:$16 sps:$4 sm:$0xff]   ;;  %v3991_v23 = vld [vmem:[#allocation4 + $0x164] ss:$16 sps:$4 sm:$0xff]  }
  0xf3   :  { %1580 = vmatpush1.bf16.msra.mxu0 %v3892_v24  ;;  %1744 = vmatpush1.bf16.msra.mxu1 %v3895_v25  ;;  %v3994_v24 = vld [vmem:[#allocation4 + $0x16c] ss:$16 sps:$4 sm:$0xff]   ;;  %v3989_v25 = vld [vmem:[#allocation4 + $0x160] ss:$16 sps:$4 sm:$0xff]  }
  0xf4   :  { %1581 = vmatprep.subr.bf16.mxu0 %v3900_v26  ;;  %1745 = vmatprep.subr.bf16.mxu1 %v3903_v27  ;;  %v3992_v26 = vld [vmem:[#allocation4 + $0x168] ss:$16 sps:$4 sm:$0xff]   ;;  %v3997_v27 = vld [vmem:[#allocation4 + $0x184] ss:$16 sps:$4 sm:$0xff]  }
  0xf7   :  { %1582 = vmatpush1.bf16.msra.mxu0 %v3898_v28  ;;  %1746 = vmatpush1.bf16.msra.mxu1 %v3901_v29  ;;  %v4000_v28 = vld [vmem:[#allocation4 + $0x18c] ss:$16 sps:$4 sm:$0xff]   ;;  %v3995_v29 = vld [vmem:[#allocation4 + $0x180] ss:$16 sps:$4 sm:$0xff]  }
  0xf8   :  { %1583 = vmatprep.subr.bf16.mxu0 %v3906_v30  ;;  %1747 = vmatprep.subr.bf16.mxu1 %v3909_v31  ;;  %v3998_v30 = vld [vmem:[#allocation4 + $0x188] ss:$16 sps:$4 sm:$0xff]   ;;  %v4003_v31 = vld [vmem:[#allocation4 + $0x1a4] ss:$16 sps:$4 sm:$0xff]  }
  0xfb   :  { %1584 = vmatpush1.bf16.msra.mxu0 %v3904_v32  ;;  %1748 = vmatpush1.bf16.msra.mxu1 %v3907_v33  ;;  %v4006_v32 = vld [vmem:[#allocation4 + $0x1ac] ss:$16 sps:$4 sm:$0xff]   ;;  %v4001_v33 = vld [vmem:[#allocation4 + $0x1a0] ss:$16 sps:$4 sm:$0xff]  }
  0xfc   :  { %1585 = vmatprep.subr.bf16.mxu0 %v3912_v34  ;;  %1749 = vmatprep.subr.bf16.mxu1 %v3915_v35  ;;  %v4004_v34 = vld [vmem:[#allocation4 + $0x1a8] ss:$16 sps:$4 sm:$0xff]   ;;  %v4009_v35 = vld [vmem:[#allocation4 + $0x1c4] ss:$16 sps:$4 sm:$0xff]  }
  0xff   :  { %1586 = vmatpush1.bf16.msra.mxu0 %v3910_v36  ;;  %1750 = vmatpush1.bf16.msra.mxu1 %v3913_v37  ;;  %v4012_v36 = vld [vmem:[#allocation4 + $0x1cc] ss:$16 sps:$4 sm:$0xff]   ;;  %v4007_v37 = vld [vmem:[#allocation4 + $0x1c0] ss:$16 sps:$4 sm:$0xff]  }
 0x100   :  { %1587 = vmatprep.subr.bf16.mxu0 %v3918_v38  ;;  %1751 = vmatprep.subr.bf16.mxu1 %v3921_v39  ;;  %v4010_v38 = vld [vmem:[#allocation4 + $0x1c8] ss:$16 sps:$4 sm:$0xff]   ;;  %v4015_v39 = vld [vmem:[#allocation4 + $0x1e4] ss:$16 sps:$4 sm:$0xff]  }
 0x103   :  { %1588 = vmatpush1.bf16.msra.mxu0 %v3916_v40  ;;  %1752 = vmatpush1.bf16.msra.mxu1 %v3919_v41  ;;  %v4018_v40 = vld [vmem:[#allocation4 + $0x1ec] ss:$16 sps:$4 sm:$0xff]   ;;  %v4013_v41 = vld [vmem:[#allocation4 + $0x1e0] ss:$16 sps:$4 sm:$0xff]  }
 0x104   :  { %2576 = vmatprep.subr.bf16.mxu0 %v3925_v42  ;;  %2658 = vmatprep.subr.bf16.mxu1 %v3928_v43  ;;  %v4016_v42 = vld [vmem:[#allocation4 + $0x1e8] ss:$16 sps:$4 sm:$0xff]   ;;  %v4021_v43 = vld [vmem:[#allocation4 + $0x204] ss:$16 sps:$4 sm:$0xff]  }
 0x106   :  { %1606 = vmatmul.mubr.bf16.vlgmr.msra.gmra.mrb[0].mxu0 %v3922_v44  ;;  %1770 = vmatmul.mubr.bf16.vlgmr.msra.gmra.mrb[0].mxu1 %v3922_v44  ;;  %v4024_v44 = vld [vmem:[#allocation4 + $0x20c] ss:$16 sps:$4 sm:$0xff]  }
 0x107   :  { %2577 = vmatpush1.bf16.msra.mxu0 %v3923_v45  ;;  %2659 = vmatpush1.bf16.msra.mxu1 %v3926_v46  ;;  %v285_v45 = vlaneseq }
 0x108   :  { %2578 = vmatprep.subr.bf16.mxu0 %v3931_v47  ;;  %2660 = vmatprep.subr.bf16.mxu1 %v3934_v48  ;;  %v4294_v48 = vld [vmem:[%s4429_s2] sm:$0xf] }
 0x109   :  { %v4288_v46 = vshrl.u32 %v285_v45, 7  ;;  %v4081_v45 = vld [vmem:[#allocation4 + $0x344] ss:$16 sps:$4 sm:$0xff]  }
 0x10b   :  { %2579 = vmatpush1.bf16.msra.mxu0 %v3929_v49  ;;  %2661 = vmatpush1.bf16.msra.mxu1 %v3932_v50  ;;  %v287_v47 = vsub.s32 0, %v4288_v46  ;;  %v291_v49 = vsub.s32 1, %v4288_v46  ;;  %v299_v50 = vsub.s32 3, %v4288_v46 }
 0x10c   :  { %2580 = vmatprep.subr.bf16.mxu0 %v3937_v51  ;;  %2662 = vmatprep.subr.bf16.mxu1 %v3940_v52 }
 0x10d   :  { %v288_v51 = vrot.slane %v4294_v48, %v287_v47  ;;  %v292_v52 = vrot.slane %v4294_v48, %v291_v49 }
 0x10f   :  { %2581 = vmatpush1.bf16.msra.mxu0 %v3935_v53  ;;  %2663 = vmatpush1.bf16.msra.mxu1 %v3938_v54  ;;  %v300_v53 = vrot.slane %v4294_v48, %v299_v50 }
 0x110   :  { %2582 = vmatprep.subr.bf16.mxu0 %v3943_v55  ;;  %2664 = vmatprep.subr.bf16.mxu1 %v3946_v56 }
 0x113   :  { %2583 = vmatpush1.bf16.msra.mxu0 %v3941_v57  ;;  %2665 = vmatpush1.bf16.msra.mxu1 %v3944_v58 }
 0x114   :  { %2584 = vmatprep.subr.bf16.mxu0 %v3949_v59  ;;  %2666 = vmatprep.subr.bf16.mxu1 %v3952_v60 }
 0x117   :  { %2585 = vmatpush1.bf16.msra.mxu0 %v3947_v61  ;;  %2667 = vmatpush1.bf16.msra.mxu1 %v3950_v62 }
 0x118   :  { %2586 = vmatprep.subr.bf16.mxu0 %v3955_v63  ;;  %2668 = vmatprep.subr.bf16.mxu1 %v3958_v0 }
 0x11b   :  { %2587 = vmatpush1.bf16.msra.mxu0 %v3953_v1  ;;  %2669 = vmatpush1.bf16.msra.mxu1 %v3956_v2 }
 0x11c   :  { %2588 = vmatprep.subr.bf16.mxu0 %v3961_v3  ;;  %2670 = vmatprep.subr.bf16.mxu1 %v3964_v4 }
 0x11f   :  { %2589 = vmatpush1.bf16.msra.mxu0 %v3959_v5  ;;  %2671 = vmatpush1.bf16.msra.mxu1 %v3962_v6  ;;  %v4019_v5 = vld [vmem:[#allocation4 + $0x200] ss:$16 sps:$4 sm:$0xff]   ;;  %v4022_v6 = vld [vmem:[#allocation4 + $0x208] ss:$16 sps:$4 sm:$0xff]  }
 0x120   :  { %2590 = vmatprep.subr.bf16.mxu0 %v3967_v7  ;;  %2672 = vmatprep.subr.bf16.mxu1 %v3970_v8  ;;  %v4027_v8 = vld [vmem:[#allocation4 + $0x224] ss:$16 sps:$4 sm:$0xff]  }
 0x123   :  { %2591 = vmatpush1.bf16.msra.mxu0 %v3965_v9  ;;  %2673 = vmatpush1.bf16.msra.mxu1 %v3968_v10  ;;  %v4030_v9 = vld [vmem:[#allocation4 + $0x22c] ss:$16 sps:$4 sm:$0xff]  }
 0x124   :  { %2592 = vmatprep.subr.bf16.mxu0 %v3973_v12  ;;  %2674 = vmatprep.subr.bf16.mxu1 %v3976_v13  ;;  %v4025_v12 = vld [vmem:[#allocation4 + $0x220] ss:$16 sps:$4 sm:$0xff]   ;;  %v4028_v13 = vld [vmem:[#allocation4 + $0x228] ss:$16 sps:$4 sm:$0xff]  }
 0x127   :  { %2593 = vmatpush1.bf16.msra.mxu0 %v3971_v14  ;;  %2675 = vmatpush1.bf16.msra.mxu1 %v3974_v15  ;;  %v4033_v14 = vld [vmem:[#allocation4 + $0x244] ss:$16 sps:$4 sm:$0xff]   ;;  %v4036_v15 = vld [vmem:[#allocation4 + $0x24c] ss:$16 sps:$4 sm:$0xff]  }
 0x128   :  { %2594 = vmatprep.subr.bf16.mxu0 %v3979_v16  ;;  %2676 = vmatprep.subr.bf16.mxu1 %v3982_v17  ;;  %v4031_v16 = vld [vmem:[#allocation4 + $0x240] ss:$16 sps:$4 sm:$0xff]   ;;  %v4034_v17 = vld [vmem:[#allocation4 + $0x248] ss:$16 sps:$4 sm:$0xff]  }
 0x12b   :  { %2595 = vmatpush1.bf16.msra.mxu0 %v3977_v18  ;;  %2677 = vmatpush1.bf16.msra.mxu1 %v3980_v19  ;;  %v4039_v18 = vld [vmem:[#allocation4 + $0x264] ss:$16 sps:$4 sm:$0xff]   ;;  %v4042_v19 = vld [vmem:[#allocation4 + $0x26c] ss:$16 sps:$4 sm:$0xff]  }
 0x12c   :  { %2596 = vmatprep.subr.bf16.mxu0 %v3985_v20  ;;  %2678 = vmatprep.subr.bf16.mxu1 %v3988_v21  ;;  %v4037_v20 = vld [vmem:[#allocation4 + $0x260] ss:$16 sps:$4 sm:$0xff]   ;;  %v4040_v21 = vld [vmem:[#allocation4 + $0x268] ss:$16 sps:$4 sm:$0xff]  }
 0x12f   :  { %2597 = vmatpush1.bf16.msra.mxu0 %v3983_v22  ;;  %2679 = vmatpush1.bf16.msra.mxu1 %v3986_v11  ;;  %v4045_v22 = vld [vmem:[#allocation4 + $0x284] ss:$16 sps:$4 sm:$0xff]   ;;  %v4048_v11 = vld [vmem:[#allocation4 + $0x28c] ss:$16 sps:$4 sm:$0xff]  }
 0x130   :  { %2598 = vmatprep.subr.bf16.mxu0 %v3991_v23  ;;  %2680 = vmatprep.subr.bf16.mxu1 %v3994_v24  ;;  %v4043_v23 = vld [vmem:[#allocation4 + $0x280] ss:$16 sps:$4 sm:$0xff]   ;;  %v4046_v24 = vld [vmem:[#allocation4 + $0x288] ss:$16 sps:$4 sm:$0xff]  }
 0x133   :  { %2599 = vmatpush1.bf16.msra.mxu0 %v3989_v25  ;;  %2681 = vmatpush1.bf16.msra.mxu1 %v3992_v26  ;;  %v4051_v25 = vld [vmem:[#allocation4 + $0x2a4] ss:$16 sps:$4 sm:$0xff]   ;;  %v4054_v26 = vld [vmem:[#allocation4 + $0x2ac] ss:$16 sps:$4 sm:$0xff]  }
 0x134   :  { %2600 = vmatprep.subr.bf16.mxu0 %v3997_v27  ;;  %2682 = vmatprep.subr.bf16.mxu1 %v4000_v28  ;;  %v4049_v27 = vld [vmem:[#allocation4 + $0x2a0] ss:$16 sps:$4 sm:$0xff]   ;;  %v4052_v28 = vld [vmem:[#allocation4 + $0x2a8] ss:$16 sps:$4 sm:$0xff]  }
 0x137   :  { %2601 = vmatpush1.bf16.msra.mxu0 %v3995_v29  ;;  %2683 = vmatpush1.bf16.msra.mxu1 %v3998_v30  ;;  %v4057_v29 = vld [vmem:[#allocation4 + $0x2c4] ss:$16 sps:$4 sm:$0xff]   ;;  %v4060_v30 = vld [vmem:[#allocation4 + $0x2cc] ss:$16 sps:$4 sm:$0xff]  }
 0x138   :  { %2602 = vmatprep.subr.bf16.mxu0 %v4003_v31  ;;  %2684 = vmatprep.subr.bf16.mxu1 %v4006_v32  ;;  %v4055_v31 = vld [vmem:[#allocation4 + $0x2c0] ss:$16 sps:$4 sm:$0xff]   ;;  %v4058_v32 = vld [vmem:[#allocation4 + $0x2c8] ss:$16 sps:$4 sm:$0xff]  }
 0x13b   :  { %2603 = vmatpush1.bf16.msra.mxu0 %v4001_v33  ;;  %2685 = vmatpush1.bf16.msra.mxu1 %v4004_v34  ;;  %v4063_v33 = vld [vmem:[#allocation4 + $0x2e4] ss:$16 sps:$4 sm:$0xff]   ;;  %v4066_v34 = vld [vmem:[#allocation4 + $0x2ec] ss:$16 sps:$4 sm:$0xff]  }
 0x13c   :  { %2604 = vmatprep.subr.bf16.mxu0 %v4009_v35  ;;  %2686 = vmatprep.subr.bf16.mxu1 %v4012_v36  ;;  %v4061_v35 = vld [vmem:[#allocation4 + $0x2e0] ss:$16 sps:$4 sm:$0xff]   ;;  %v4064_v36 = vld [vmem:[#allocation4 + $0x2e8] ss:$16 sps:$4 sm:$0xff]  }
 0x13f   :  { %2605 = vmatpush1.bf16.msra.mxu0 %v4007_v37  ;;  %2687 = vmatpush1.bf16.msra.mxu1 %v4010_v38  ;;  %v4069_v37 = vld [vmem:[#allocation4 + $0x304] ss:$16 sps:$4 sm:$0xff]   ;;  %v4072_v38 = vld [vmem:[#allocation4 + $0x30c] ss:$16 sps:$4 sm:$0xff]  }
 0x140   :  { %2606 = vmatprep.subr.bf16.mxu0 %v4015_v39  ;;  %2688 = vmatprep.subr.bf16.mxu1 %v4018_v40  ;;  %v4067_v39 = vld [vmem:[#allocation4 + $0x300] ss:$16 sps:$4 sm:$0xff]   ;;  %v4070_v40 = vld [vmem:[#allocation4 + $0x308] ss:$16 sps:$4 sm:$0xff]  }
 0x143   :  { %2607 = vmatpush1.bf16.msra.mxu0 %v4013_v41  ;;  %2689 = vmatpush1.bf16.msra.mxu1 %v4016_v42  ;;  %v4075_v41 = vld [vmem:[#allocation4 + $0x324] ss:$16 sps:$4 sm:$0xff]   ;;  %v4078_v42 = vld [vmem:[#allocation4 + $0x32c] ss:$16 sps:$4 sm:$0xff]  }
 0x144   :  { %2617 = vmatprep.subr.bf16.mxu0 %v4021_v43  ;;  %2699 = vmatprep.subr.bf16.mxu1 %v4024_v44  ;;  %v4073_v43 = vld [vmem:[#allocation4 + $0x320] ss:$16 sps:$4 sm:$0xff]   ;;  %v4076_v44 = vld [vmem:[#allocation4 + $0x328] ss:$16 sps:$4 sm:$0xff]  }
 0x1d9   :  { %v1607_v54 = vpop.f32.mrb[0].mxu0  ;;  %v4307_v55 = vpop.f32.mrb[0].mxu1 }
 0x1da   :  { %v3535_v56 = vadd.f32 %v1607_v54, %v288_v51  ;;  %v1609_v57 = vpop.f32.mrb[1].mxu0  ;;  %v1773_v58 = vpop.f32.mrb[1].mxu1  ;;  %v4084_v51 = vld [vmem:[#allocation4 + $0x34c] ss:$16 sps:$4 sm:$0xff]   ;;  %v4087_v54 = vld [vmem:[#allocation4 + $0x364] ss:$16 sps:$4 sm:$0xff]  }
 0x1db   :  { %v3536_v59 = vadd.f32 %v1609_v57, %v292_v52  ;;  %v3538_v60 = vadd.f32 %v1773_v58, %v300_v53  ;;  %v1611_v61 = vpop.f32.mrb[2].mxu0  ;;  %v1775_v62 = vpop.f32.mrb[2].mxu1  ;;  %v4079_v52 = vld [vmem:[#allocation4 + $0x340] ss:$16 sps:$4 sm:$0xff]   ;;  %v4082_v53 = vld [vmem:[#allocation4 + $0x348] ss:$16 sps:$4 sm:$0xff]  }
 0x1dc   :  { %v1778_v63 = vmax.f32 %v3535_v56, 0.0  ;;  %v1612_v0 = vpop.f32.mrb[3].mxu0  ;;  %v1776_v1 = vpop.f32.mrb[3].mxu1  ;;  %v4090_v56 = vld [vmem:[#allocation4 + $0x36c] ss:$16 sps:$4 sm:$0xff]  }
 0x1dd   :  { %v1779_v2 = vmax.f32 %v3536_v59, 0.0  ;;  %v1781_v3 = vmax.f32 %v3538_v60, 0.0  ;;  %v4085_v57 = vld [vmem:[#allocation4 + $0x360] ss:$16 sps:$4 sm:$0xff]   ;;  %v4088_v58 = vld [vmem:[#allocation4 + $0x368] ss:$16 sps:$4 sm:$0xff]  }
 0x1de   :  { %v1782_v7 = vpack.c.bf16 %v1778_v63, %v1778_v63  ;;  %v4093_v59 = vld [vmem:[#allocation4 + $0x384] ss:$16 sps:$4 sm:$0xff]   ;;  %v4096_v60 = vld [vmem:[#allocation4 + $0x38c] ss:$16 sps:$4 sm:$0xff]   ;;  %v4091_v61 = vld [vmem:[#allocation4 + $0x380] ss:$16 sps:$4 sm:$0xff]  }
 0x1df   :  { %v1783_v4 = vpack.c.bf16 %v1779_v2, %v1779_v2  ;;  %v1785_v10 = vpack.c.bf16 %v1781_v3, %v1781_v3  ;;  %v4094_v62 = vld [vmem:[#allocation4 + $0x388] ss:$16 sps:$4 sm:$0xff]   ;;  %v295_v63 = vsub.s32 2, %v4288_v46  ;;  %v4099_v0 = vld [vmem:[#allocation4 + $0x3a4] ss:$16 sps:$4 sm:$0xff]  }
 0x1e0   :  { %v4102_v1 = vld [vmem:[#allocation4 + $0x3ac] ss:$16 sps:$4 sm:$0xff]   ;;  %v4097_v2 = vld [vmem:[#allocation4 + $0x3a0] ss:$16 sps:$4 sm:$0xff]   ;;  %v4100_v3 = vld [vmem:[#allocation4 + $0x3a8] ss:$16 sps:$4 sm:$0xff]  }
 0x1e1   :  { %2608 = vmatprep.mubr.bf16.mxu0 %v1783_v4  ;;  %2690 = vmatprep.mubr.bf16.mxu1 %v1783_v4  ;;  %v296_v4 = vrot.slane %v4294_v48, %v295_v63  ;;  %v4115_v48 = vld [vmem:[%s4432_s5 + $0x40] sm:$0xff]  }
 0x1e2   :  { %2609 = vmatmul.mubr.bf16.vlgmr.msra.gmra.mrb[4].mxu0 %v1782_v7  ;;  %2691 = vmatmul.mubr.bf16.vlgmr.msra.gmra.mrb[4].mxu1 %v1782_v7  ;;  %v4103_v7 = vld [vmem:[#allocation4 + $0x3c0] ss:$16 sps:$4 sm:$0xff]  }
 0x1e3   :  { %2618 = vmatpush1.bf16.msra.mxu0 %v4019_v5  ;;  %2700 = vmatpush1.bf16.msra.mxu1 %v4022_v6  ;;  %v4105_v5 = vld [vmem:[#allocation4 + $0x3c4] ss:$16 sps:$4 sm:$0xff]   ;;  %v4108_v6 = vld [vmem:[#allocation4 + $0x3cc] ss:$16 sps:$4 sm:$0xff]  }
 0x1e4   :  { %2649 = vmatprep.mubr.bf16.mxu0 %v1785_v10  ;;  %2731 = vmatprep.mubr.bf16.mxu1 %v1785_v10  ;;  %v4111_v10 = vld [vmem:[#allocation4 + $0x3e4] ss:$16 sps:$4 sm:$0xff]  }
 0x1e5   :  { %2619 = vmatprep.subr.bf16.mxu0 %v4027_v8  ;;  %2701 = vmatprep.subr.bf16.mxu1 %v4030_v9  ;;  %v4106_v8 = vld [vmem:[#allocation4 + $0x3c8] ss:$16 sps:$4 sm:$0xff]   ;;  %v3537_v9 = vadd.f32 %v4307_v55, %v296_v4  ;;  %v4117_v55 = vld [vmem:[%s4432_s5] sm:$0xff]  }
 0x1e7   :  { %2620 = vmatpush1.bf16.msra.mxu0 %v4025_v12  ;;  %2702 = vmatpush1.bf16.msra.mxu1 %v4028_v13  ;;  %v4114_v12 = vld [vmem:[#allocation4 + $0x3ec] ss:$16 sps:$4 sm:$0xff]   ;;  %v4109_v13 = vld [vmem:[#allocation4 + $0x3e0] ss:$16 sps:$4 sm:$0xff]  }
 0x1e8   :  { %2621 = vmatprep.subr.bf16.mxu0 %v4033_v14  ;;  %2703 = vmatprep.subr.bf16.mxu1 %v4036_v15  ;;  %v4112_v14 = vld [vmem:[#allocation4 + $0x3e8] ss:$16 sps:$4 sm:$0xff]   ;;  %v1780_v15 = vmax.f32 %v3537_v9, 0.0 }
 0x1eb   :  { %2622 = vmatpush1.bf16.msra.mxu0 %v4031_v16  ;;  %2704 = vmatpush1.bf16.msra.mxu1 %v4034_v17  ;;  %v4116_v16 = vld [vmem:[%s4432_s5 + $0xc0] sm:$0xff]  }
 0x1ec   :  { %2623 = vmatprep.subr.bf16.mxu0 %v4039_v18  ;;  %2705 = vmatprep.subr.bf16.mxu1 %v4042_v19  ;;  %v4118_v17 = vld [vmem:[%s4432_s5 + $0x80] sm:$0xff]   ;;  %v1784_v18 = vpack.c.bf16 %v1780_v15, %v1780_v15  ;;  %v4119_v19 = vld [vmem:[%s4432_s5 + $0x48] sm:$0xff]  }
 0x1ef   :  { %2624 = vmatpush1.bf16.msra.mxu0 %v4037_v20  ;;  %2706 = vmatpush1.bf16.msra.mxu1 %v4040_v21  ;;  %v4120_v20 = vld [vmem:[%s4432_s5 + $0xc8] sm:$0xff]  }
 0x1f0   :  { %2625 = vmatprep.subr.bf16.mxu0 %v4045_v22  ;;  %2707 = vmatprep.subr.bf16.mxu1 %v4048_v11  ;;  %v4121_v21 = vld [vmem:[%s4432_s5 + $0x8] sm:$0xff]   ;;  %v4123_v11 = vld [vmem:[%s4432_s5 + $0x50] sm:$0xff]  }
 0x1f1   :  { %v4122_v22 = vld [vmem:[%s4432_s5 + $0x88] sm:$0xff]  }
 0x1f3   :  { %2626 = vmatpush1.bf16.msra.mxu0 %v4043_v23  ;;  %2708 = vmatpush1.bf16.msra.mxu1 %v4046_v24  ;;  %v4124_v23 = vld [vmem:[%s4432_s5 + $0xd0] sm:$0xff]  }
 0x1f4   :  { %2627 = vmatprep.subr.bf16.mxu0 %v4051_v25  ;;  %2709 = vmatprep.subr.bf16.mxu1 %v4054_v26  ;;  %v4125_v24 = vld [vmem:[%s4432_s5 + $0x10] sm:$0xff]   ;;  %v4127_v26 = vld [vmem:[%s4432_s5 + $0x58] sm:$0xff]  }
 0x1f5   :  { %v4126_v25 = vld [vmem:[%s4432_s5 + $0x90] sm:$0xff]  }
 0x1f7   :  { %2628 = vmatpush1.bf16.msra.mxu0 %v4049_v27  ;;  %2710 = vmatpush1.bf16.msra.mxu1 %v4052_v28  ;;  %v4128_v27 = vld [vmem:[%s4432_s5 + $0xd8] sm:$0xff]  }
 0x1f8   :  { %2629 = vmatprep.subr.bf16.mxu0 %v4057_v29  ;;  %2711 = vmatprep.subr.bf16.mxu1 %v4060_v30  ;;  %v4129_v28 = vld [vmem:[%s4432_s5 + $0x18] sm:$0xff]   ;;  %v4131_v30 = vld [vmem:[%s4432_s5 + $0x60] sm:$0xff]  }
 0x1f9   :  { %v4130_v29 = vld [vmem:[%s4432_s5 + $0x98] sm:$0xff]  }
 0x1fb   :  { %2630 = vmatpush1.bf16.msra.mxu0 %v4055_v31  ;;  %2712 = vmatpush1.bf16.msra.mxu1 %v4058_v32  ;;  %v4132_v31 = vld [vmem:[%s4432_s5 + $0xe0] sm:$0xff]  }
 0x1fc   :  { %2631 = vmatprep.subr.bf16.mxu0 %v4063_v33  ;;  %2713 = vmatprep.subr.bf16.mxu1 %v4066_v34  ;;  %v4133_v32 = vld [vmem:[%s4432_s5 + $0x20] sm:$0xff]   ;;  %v4135_v34 = vld [vmem:[%s4432_s5 + $0x68] sm:$0xff]  }
 0x1fd   :  { %v4134_v33 = vld [vmem:[%s4432_s5 + $0xa0] sm:$0xff]  }
 0x1ff   :  { %2632 = vmatpush1.bf16.msra.mxu0 %v4061_v35  ;;  %2714 = vmatpush1.bf16.msra.mxu1 %v4064_v36  ;;  %v4136_v35 = vld [vmem:[%s4432_s5 + $0xe8] sm:$0xff]  }
 0x200   :  { %2633 = vmatprep.subr.bf16.mxu0 %v4069_v37  ;;  %2715 = vmatprep.subr.bf16.mxu1 %v4072_v38  ;;  %v4137_v36 = vld [vmem:[%s4432_s5 + $0x28] sm:$0xff]   ;;  %v4139_v38 = vld [vmem:[%s4432_s5 + $0x70] sm:$0xff]  }
 0x201   :  { %v4138_v37 = vld [vmem:[%s4432_s5 + $0xa8] sm:$0xff]  }
 0x203   :  { %2634 = vmatpush1.bf16.msra.mxu0 %v4067_v39  ;;  %2716 = vmatpush1.bf16.msra.mxu1 %v4070_v40  ;;  %v4140_v39 = vld [vmem:[%s4432_s5 + $0xf0] sm:$0xff]  }
 0x204   :  { %2635 = vmatprep.subr.bf16.mxu0 %v4075_v41  ;;  %2717 = vmatprep.subr.bf16.mxu1 %v4078_v42  ;;  %v4141_v40 = vld [vmem:[%s4432_s5 + $0x30] sm:$0xff]   ;;  %v4143_v42 = vld [vmem:[%s4432_s5 + $0x78] sm:$0xff]  }
 0x205   :  { %v4142_v41 = vld [vmem:[%s4432_s5 + $0xb0] sm:$0xff]  }
 0x207   :  { %2636 = vmatpush1.bf16.msra.mxu0 %v4073_v43  ;;  %2718 = vmatpush1.bf16.msra.mxu1 %v4076_v44  ;;  %v4144_v43 = vld [vmem:[%s4432_s5 + $0xf8] sm:$0xff]  }
 0x208   :  { %2637 = vmatprep.subr.bf16.mxu0 %v4081_v45  ;;  %2719 = vmatprep.subr.bf16.mxu1 %v4084_v51  ;;  %v4145_v44 = vld [vmem:[%s4432_s5 + $0x38] sm:$0xff]   ;;  %v1914_v51 = vld [vmem:[%s4431_s4] sm:$0xf] }
 0x209   :  { %v4146_v45 = vld [vmem:[%s4432_s5 + $0xb8] sm:$0xff]  }
 0x20b   :  { %2638 = vmatpush1.bf16.msra.mxu0 %v4079_v52  ;;  %2720 = vmatpush1.bf16.msra.mxu1 %v4082_v53  ;;  %v1919_v52 = vrot.slane %v1914_v51, %v287_v47  ;;  %v1927_v53 = vrot.slane %v1914_v51, %v295_v63 }
 0x20c   :  { %2639 = vmatprep.subr.bf16.mxu0 %v4087_v54  ;;  %2721 = vmatprep.subr.bf16.mxu1 %v4090_v56  ;;  %v1923_v54 = vrot.slane %v1914_v51, %v291_v49  ;;  %v1931_v56 = vrot.slane %v1914_v51, %v299_v50 }
 0x20f   :  { %2640 = vmatpush1.bf16.msra.mxu0 %v4085_v57  ;;  %2722 = vmatpush1.bf16.msra.mxu1 %v4088_v58 }
 0x210   :  { %2641 = vmatprep.subr.bf16.mxu0 %v4093_v59  ;;  %2723 = vmatprep.subr.bf16.mxu1 %v4096_v60 }
 0x213   :  { %2642 = vmatpush1.bf16.msra.mxu0 %v4091_v61  ;;  %2724 = vmatpush1.bf16.msra.mxu1 %v4094_v62 }
 0x214   :  { %2643 = vmatprep.subr.bf16.mxu0 %v4099_v0  ;;  %2725 = vmatprep.subr.bf16.mxu1 %v4102_v1 }
 0x217   :  { %2644 = vmatpush1.bf16.msra.mxu0 %v4097_v2  ;;  %2726 = vmatpush1.bf16.msra.mxu1 %v4100_v3 }
 0x218   :  { %2645 = vmatprep.subr.bf16.mxu0 %v4105_v5  ;;  %2727 = vmatprep.subr.bf16.mxu1 %v4108_v6 }
 0x21b   :  { %2646 = vmatpush1.bf16.msra.mxu0 %v4103_v7  ;;  %2728 = vmatpush1.bf16.msra.mxu1 %v4106_v8 }
 0x21c   :  { %2647 = vmatprep.subr.bf16.mxu0 %v4111_v10  ;;  %2729 = vmatprep.subr.bf16.mxu1 %v4114_v12  ;;  %v3458_v12 = vld [vmem:[%s4433_s6] ss:$0 sm:$0xff] }
 0x21f   :  { %2648 = vmatpush1.bf16.msra.mxu0 %v4109_v13  ;;  %2730 = vmatpush1.bf16.msra.mxu1 %v4112_v14 }
 0x220   :  { %3491 = vmatprep.subr.bf16.mxu0 %v4115_v48  ;;  %3513 = vmatprep.subr.bf16.mxu1 %v4116_v16 }
 0x222   :  { %2650 = vmatmul.mubr.bf16.vlgmr.msra.gmra.mrb[4].mxu0 %v1784_v18  ;;  %2732 = vmatmul.mubr.bf16.vlgmr.msra.gmra.mrb[4].mxu1 %v1784_v18 }
 0x223   :  { %3492 = vmatpush3.bf16.msra.mxu0 %v4117_v55  ;;  %3514 = vmatpush3.bf16.msra.mxu1 %v4118_v17 }
 0x224   :  { %3493 = vmatprep.subr.bf16.mxu0 %v4119_v19  ;;  %3515 = vmatprep.subr.bf16.mxu1 %v4120_v20 }
 0x227   :  { %3494 = vmatpush3.bf16.msra.mxu0 %v4121_v21  ;;  %3516 = vmatpush3.bf16.msra.mxu1 %v4122_v22 }
 0x228   :  { %3495 = vmatprep.subr.bf16.mxu0 %v4123_v11  ;;  %3517 = vmatprep.subr.bf16.mxu1 %v4124_v23 }
 0x22b   :  { %3496 = vmatpush3.bf16.msra.mxu0 %v4125_v24  ;;  %3518 = vmatpush3.bf16.msra.mxu1 %v4126_v25 }
 0x22c   :  { %3497 = vmatprep.subr.bf16.mxu0 %v4127_v26  ;;  %3519 = vmatprep.subr.bf16.mxu1 %v4128_v27 }
 0x22f   :  { %3498 = vmatpush3.bf16.msra.mxu0 %v4129_v28  ;;  %3520 = vmatpush3.bf16.msra.mxu1 %v4130_v29 }
 0x230   :  { %3499 = vmatprep.subr.bf16.mxu0 %v4131_v30  ;;  %3521 = vmatprep.subr.bf16.mxu1 %v4132_v31 }
 0x233   :  { %3500 = vmatpush3.bf16.msra.mxu0 %v4133_v32  ;;  %3522 = vmatpush3.bf16.msra.mxu1 %v4134_v33 }
 0x234   :  { %3501 = vmatprep.subr.bf16.mxu0 %v4135_v34  ;;  %3523 = vmatprep.subr.bf16.mxu1 %v4136_v35 }
 0x237   :  { %3502 = vmatpush3.bf16.msra.mxu0 %v4137_v36  ;;  %3524 = vmatpush3.bf16.msra.mxu1 %v4138_v37 }
 0x238   :  { %3503 = vmatprep.subr.bf16.mxu0 %v4139_v38  ;;  %3525 = vmatprep.subr.bf16.mxu1 %v4140_v39 }
 0x23b   :  { %3504 = vmatpush3.bf16.msra.mxu0 %v4141_v40  ;;  %3526 = vmatpush3.bf16.msra.mxu1 %v4142_v41 }
 0x23c   :  { %3505 = vmatprep.subr.bf16.mxu0 %v4143_v42  ;;  %3527 = vmatprep.subr.bf16.mxu1 %v4144_v43 }
 0x23f   :  { %3506 = vmatpush3.bf16.msra.mxu0 %v4145_v44  ;;  %3528 = vmatpush3.bf16.msra.mxu1 %v4146_v45 }
 0x2f5   :  { %v2651_v57 = vpop.f32.mrb[4].mxu0  ;;  %v2733_v58 = vpop.f32.mrb[4].mxu1 }
 0x2f6   :  { %v3539_v59 = vadd.f32 %v2651_v57, %v1919_v52  ;;  %v3541_v60 = vadd.f32 %v2733_v58, %v1927_v53  ;;  %v2653_v61 = vpop.f32.mrb[5].mxu0  ;;  %v2735_v62 = vpop.f32.mrb[5].mxu1 }
 0x2f7   :  { %v3540_v0 = vadd.f32 %v2653_v61, %v1923_v54  ;;  %v3542_v1 = vadd.f32 %v2735_v62, %v1931_v56  ;;  %v2655_v2 = vpop.f32.mrb[6].mxu0  ;;  %v2737_v3 = vpop.f32.mrb[6].mxu1 }
 0x2f8   :  { %v2740_v47 = vmax.f32 %v3539_v59, 0.0  ;;  %v2742_v4 = vmax.f32 %v3541_v60, 0.0  ;;  %v2656_v5 = vpop.f32.mrb[7].mxu0  ;;  %v2738_v63 = vpop.f32.mrb[7].mxu1 }
 0x2f9   :  { %v2741_v6 = vmax.f32 %v3540_v0, 0.0  ;;  %v2743_v7 = vmax.f32 %v3542_v1, 0.0 }
 0x2fa   :  { %v2744_v46 = vpack.c.bf16 %v2740_v47, %v2740_v47  ;;  %v2746_v50 = vpack.c.bf16 %v2742_v4, %v2742_v4 }
 0x2fb   :  { %v2745_v49 = vpack.c.bf16 %v2741_v6, %v2741_v6  ;;  %v2747_v8 = vpack.c.bf16 %v2743_v7, %v2743_v7 }
 0x2fd   :  { %3043 = vmatprep.mubr.bf16.mxu0 %v2745_v49  ;;  %3083 = vmatprep.mubr.bf16.mxu1 %v2747_v8 }
 0x2fe   :  { %3044 = vmatmul.mubr.bf16.vlgmr.msra.gmra.mrb[8].mxu0 %v2744_v46  ;;  %3084 = vmatmul.mubr.bf16.vlgmr.msra.gmra.mrb[8].mxu1 %v2746_v50 }
 0x3d1   :  { %v3507_v9 = vpop.f32.mrb[8].mxu0  ;;  %v3529_v10 = vpop.f32.mrb[8].mxu1 }
 0x3d2   :  { %v3508_v13 = vpop.f32.mrb[9].mxu0  ;;  %v3530_v14 = vpop.f32.mrb[9].mxu1 }
 0x3d3   :  { %v3509_v15 = vadd.f32 %v3508_v13, %v3507_v9  ;;  %v3531_v48 = vadd.f32 %v3530_v14, %v3529_v10  ;;  %v3510_v16 = vpop.f32.mrb[10].mxu0  ;;  %v3532_v55 = vpop.f32.mrb[10].mxu1 }
 0x3d4   :  { %v3511_v17 = vpop.f32.mrb[11].mxu0  ;;  %v3533_v18 = vpop.f32.mrb[11].mxu1 }
 0x3d5   :  { %v3046_v19 = vadd.f32 %v3509_v15, %v3458_v12 }
 0x3d7   :  { %v3086_v20 = vadd.f32 %v3531_v48, %v3046_v19 }
 0x3d9   :  { %v3091_v21 = vpack.c.bf16 %v3086_v20, %v3086_v20 }
 0x3db   :  { %3092 = vst [vmem:[%s4434_s7] sm:$0xf] %v3091_v21 }
 0x3dc   :  { %3097 = vsyncpa [#allocation3], 1 }
 0x3dd   :  { %3098 = vsyncpa [#allocation5], 1 }

</bundles_post_ra>
